<compile_context>
chip_gen: v7x
topology: tpu7x:2x2x1
jax: 0.10.0
libtpu: 0.0.40
codegen_flags: <defaults>
</compile_context>

<pallas_src>
import functools

import numpy as np
import jax
import jax.numpy as jnp
from jax import lax
from jax.experimental import pallas as pl
from jax.experimental.pallas import tpu as pltpu

LEAKY_SLOPE = 0.2
BN_EPS = 1e-5
_STAT_SLICES = 2   # leading "parallel" axis of pass 1 (maps to v7x's 2 TCs)


def _round_up(x, m):
    return (x + m - 1) // m * m


def _cdiv(a, b):
    return -(-a // b)


def _pad_to(x, shape):
    return jnp.pad(x, [(0, s - d) for d, s in zip(x.shape, shape)])


def _lrelu(x):
    return jnp.maximum(x, LEAKY_SLOPE * x)


def _vmem_limit_bytes(tp, kp, c1p, c2p):
    """Explicit scoped-VMEM budget (defaults: v5e 16 MiB, v6e/v7x 32 MiB)."""
    patches = 2 * tp * kp * 2                        # double-buffered bf16 patches
    weights = 2 * (kp * c1p + c1p * c2p) * 2 + 8 * c2p * 4
    temps = 6 * tp * c2p * 4                         # live f32 h1/h2/h2^2/concat
    need = patches + weights + temps + (2 << 20)
    # floor above the small default scoped limits, ceiling below v7x's 64 MiB
    # physical VMEM per TensorCore (v5e/v6e physical is 128 MiB).
    return int(min(max(need, 32 * 1024 * 1024), 56 * 1024 * 1024))


def _conv12_tile(patches_ref, w1_ref, b1_ref, w2_ref, b2_ref):
    """conv1 (3x3 via im2col patches) -> LReLU -> conv2 (1x1); f32 result."""
    h1 = jnp.dot(patches_ref[...], w1_ref[...],
                 preferred_element_type=jnp.float32) + b1_ref[...]
    h1 = _lrelu(h1)
    h2 = jnp.dot(h1.astype(jnp.bfloat16), w2_ref[...],
                 preferred_element_type=jnp.float32) + b2_ref[...]
    return h2                                            # (TP, C2p) f32


def _stats_kernel(patches_ref, w1_ref, b1_ref, w2_ref, b2_ref, stats_ref,
                  *, n_valid, n_inner):
    """Pass 1: per-channel [sum | sum-of-squares] of the pre-BN conv2 output.

    Grid = (stat_slices, n_inner): the leading axis is "parallel" (one slice
    per TensorCore on v7x, each with its own (1, 2*C2p) partial row); the inner
    axis is the pixel-tile reduction ("arbitrary")."""
    c = pl.program_id(0)
    i = pl.program_id(1)

    @pl.when(i == 0)
    def _init():
        stats_ref[...] = jnp.zeros_like(stats_ref)

    h2 = _conv12_tile(patches_ref, w1_ref, b1_ref, w2_ref, b2_ref)

    tp = patches_ref.shape[0]
    # Row-validity mask laid out on the lane axis so the pixel reduction runs
    # on the MXU (vector-matrix product) instead of a cross-sublane XLU sum.
    pix = (c * n_inner + i) * tp + lax.broadcasted_iota(jnp.int32, (1, tp), 1)
    mrow = (pix < n_valid).astype(jnp.float32)            # (1, TP)

    # Single fused reduction matmul: (1, TP) @ (TP, 2*C2p) -> [sum | ssq].
    rhs = jnp.concatenate([h2, h2 * h2], axis=1)
    stats_ref[...] += jnp.dot(mrow, rhs, preferred_element_type=jnp.float32)


def _apply_kernel(patches_ref, w1_ref, b1_ref, w2_ref, b2_ref,
                  scale_ref, shift_ref, w3_ref, out_ref):
    """Pass 2: recompute conv1/conv2, apply BN affine + LReLU, conv3 (1x1 ->
    1 channel, bias folded into a spare channel) and sigmoid; the output is
    packed lane-dense as a bf16 (1, TP) row of pixels."""
    h2 = _conv12_tile(patches_ref, w1_ref, b1_ref, w2_ref, b2_ref)
    h2 = _lrelu(h2 * scale_ref[...] + shift_ref[...])      # BN + LeakyReLU

    # conv3: (1, C2p) x (TP, C2p)^T -> (1, TP): pixels land on the lane axis;
    # the RHS-contracted dot stays on the MXU and the conv1/conv2 matmuls
    # dominate the extended-slot budget, so any relayout here is hidden.
    h3 = lax.dot_general(w3_ref[...], h2.astype(jnp.bfloat16),
                         (((1,), (1,)), ((), ())),
                         preferred_element_type=jnp.float32)

    # Numerically robust sigmoid; reciprocal goes to the (otherwise idle) EUP.
    z = jnp.exp(-jnp.abs(h3))
    r = pl.reciprocal(1.0 + z, approx=True)
    out_ref[...] = jnp.where(h3 >= 0.0, r, z * r).astype(out_ref.dtype)


def discriminator_pixelgan_forward(x, params, *, tp=2048):
    """x: NCHW float32 (N, in_c+out_c, H, W) -> (N, 1, H-2, W-2).

    tp: pixel tile (multiple of 128). 2048 is a good default on all current
    generations; v6e can push to 8192, keep <=4096 on v5e."""
    w1, b1, w2, b2, gamma, beta, w3, b3 = params           # PyTorch OIHW layout
    N, Cin, H, W = x.shape
    Ho, Wo = H - 2, W - 2
    C1 = w1.shape[0]
    C2 = w2.shape[0]

    # ---- glue: bf16 im2col to (P, Cin*9), feature order c*9 + dy*3 + dx ----
    xb = x.astype(jnp.bfloat16)          # glue materializes bf16, not f32
    cols = []
    for dy in range(3):
        for dx in range(3):
            cols.append(xb[:, :, dy:dy + Ho, dx:dx + Wo])   # (N, Cin, Ho, Wo)
    patches = jnp.stack(cols, axis=2)                       # (N, Cin, 9, Ho, Wo)
    patches = patches.reshape(N, Cin * 9, Ho, Wo)
    patches = patches.transpose(0, 2, 3, 1).reshape(N * Ho * Wo, Cin * 9)

    P, K = N * Ho * Wo, Cin * 9
    tp = max(128, _round_up(tp, 128))
    n_tiles = _cdiv(P, tp)
    stat_slices = _STAT_SLICES if n_tiles >= _STAT_SLICES else 1
    n_inner = _cdiv(n_tiles, stat_slices)
    n_tiles = stat_slices * n_inner
    Pp = n_tiles * tp
    Kp = _round_up(K, 16)                 # bf16 sublane packing; no 128-lane pad
    C1p = _round_up(C1, 128)
    C2p = _round_up(C2 + 1, 128)          # +1 spare channel carries the conv3 bias

    patches_p = _pad_to(patches, (Pp, Kp)).astype(jnp.bfloat16)
    w1m = _pad_to(w1.reshape(C1, K).T, (Kp, C1p)).astype(jnp.bfloat16)
    b1m = _pad_to(b1.reshape(1, C1), (1, C1p)).astype(jnp.float32)
    w2m = _pad_to(w2.reshape(C2, C1).T, (C1p, C2p)).astype(jnp.bfloat16)
    b2m = _pad_to(b2.reshape(1, C2), (1, C2p)).astype(jnp.float32)
    w3aug = jnp.concatenate([w3.reshape(1, C2), b3.reshape(1, 1)], axis=1)
    w3m = _pad_to(w3aug, (1, C2p)).astype(jnp.bfloat16)     # col C2 holds b3

    vmem_limit = _vmem_limit_bytes(tp, Kp, C1p, C2p)
    stats_width = 2 * C2p

    # ---- pass 1: BN batch statistics ("parallel" slice axis x "arbitrary") ----
    p1_patches = pl.BlockSpec((tp, Kp), lambda c, i: (c * n_inner + i, 0))
    p1_w1 = pl.BlockSpec((Kp, C1p), lambda c, i: (0, 0))
    p1_b1 = pl.BlockSpec((1, C1p), lambda c, i: (0, 0))
    p1_w2 = pl.BlockSpec((C1p, C2p), lambda c, i: (0, 0))
    p1_b2 = pl.BlockSpec((1, C2p), lambda c, i: (0, 0))

    stats_row = pl.pallas_call(
        functools.partial(_stats_kernel, n_valid=P, n_inner=n_inner),
        grid=(stat_slices, n_inner),
        in_specs=[p1_patches, p1_w1, p1_b1, p1_w2, p1_b2],
        out_specs=pl.BlockSpec((1, stats_width), lambda c, i: (0, c)),
        out_shape=jax.ShapeDtypeStruct((1, stat_slices * stats_width),
                                       jnp.float32),
        compiler_params=pltpu.CompilerParams(
            dimension_semantics=("parallel", "arbitrary"),
            vmem_limit_bytes=vmem_limit),
    )(patches_p, w1m, b1m, w2m, b2m)

    # ---- tiny BN epilogue in plain JAX (training-mode biased variance) ----
    stats = stats_row.reshape(stat_slices, stats_width).sum(axis=0)
    sums = stats[:C2p].reshape(1, C2p)
    sumsq = stats[C2p:].reshape(1, C2p)
    gamma_p = _pad_to(gamma.reshape(1, C2), (1, C2p)).astype(jnp.float32)
    beta_p = _pad_to(beta.reshape(1, C2), (1, C2p)).astype(jnp.float32)
    mean = sums / P
    var = jnp.maximum(sumsq / P - mean * mean, 0.0)         # clamp cancellation
    scale = gamma_p * lax.rsqrt(var + BN_EPS)                # (1, C2p)
    shift = beta_p - mean * scale                            # (1, C2p)
    shift = shift.at[0, C2].set(1.0)    # spare channel = const 1 -> conv3 bias

    # ---- pass 2: BN + LReLU + conv3 + sigmoid (independent -> "parallel") ----
    p2_patches = pl.BlockSpec((tp, Kp), lambda i: (i, 0))
    p2_w1 = pl.BlockSpec((Kp, C1p), lambda i: (0, 0))
    p2_b1 = pl.BlockSpec((1, C1p), lambda i: (0, 0))
    p2_w2 = pl.BlockSpec((C1p, C2p), lambda i: (0, 0))
    p2_b2 = pl.BlockSpec((1, C2p), lambda i: (0, 0))
    p2_vec = pl.BlockSpec((1, C2p), lambda i: (0, 0))

    out_row = pl.pallas_call(
        _apply_kernel,
        grid=(n_tiles,),
        in_specs=[p2_patches, p2_w1, p2_b1, p2_w2, p2_b2,
                  p2_vec, p2_vec, p2_vec],
        out_specs=pl.BlockSpec((1, tp), lambda i: (0, i)),
        out_shape=jax.ShapeDtypeStruct((1, Pp), jnp.bfloat16),
        compiler_params=pltpu.CompilerParams(
            dimension_semantics=("parallel",),
            vmem_limit_bytes=vmem_limit),
    )(patches_p, w1m, b1m, w2m, b2m, scale, shift, w3m)

    # ---- glue: unpack lane-dense bf16 row back to NCHW f32 ----
    out = out_row[0, :P].astype(jnp.float32).reshape(N, Ho, Wo)
    return out[:, None, :, :]


def init_params(key, in_c, out_c, ndf):
    cin = in_c + out_c
    c1, c2 = ndf * 2, ndf
    ks = jax.random.split(key, 6)
    w1 = jax.random.normal(ks[0], (c1, cin, 3, 3), jnp.float32) * 0.1
    b1 = jax.random.normal(ks[1], (c1,), jnp.float32) * 0.1
    w2 = jax.random.normal(ks[2], (c2, c1, 1, 1), jnp.float32) * 0.1
    b2 = jax.random.normal(ks[3], (c2,), jnp.float32) * 0.1
    gamma = jnp.ones((c2,), jnp.float32)
    beta = jnp.zeros((c2,), jnp.float32)
    w3 = jax.random.normal(ks[4], (1, c2, 1, 1), jnp.float32) * 0.1
    b3 = jax.random.normal(ks[5], (1,), jnp.float32) * 0.1
    return (w1, b1, w2, b2, gamma, beta, w3, b3)


def reference_forward(x, params):
    """Pure-JAX reference mirroring the PyTorch forward (train-mode BN)."""
    w1, b1, w2, b2, gamma, beta, w3, b3 = params
    dn = ('NCHW', 'OIHW', 'NCHW')
    y = lax.conv_general_dilated(x, w1, (1, 1), 'VALID', dimension_numbers=dn)
    y = y + b1[None, :, None, None]
    y = jnp.maximum(y, LEAKY_SLOPE * y)
    y = lax.conv_general_dilated(y, w2, (1, 1), 'VALID', dimension_numbers=dn)
    y = y + b2[None, :, None, None]
    mean = jnp.mean(y, axis=(0, 2, 3), keepdims=True)
    var = jnp.mean((y - mean) ** 2, axis=(0, 2, 3), keepdims=True)
    y = (y - mean) / jnp.sqrt(var + BN_EPS)
    y = y * gamma[None, :, None, None] + beta[None, :, None, None]
    y = jnp.maximum(y, LEAKY_SLOPE * y)
    y = lax.conv_general_dilated(y, w3, (1, 1), 'VALID', dimension_numbers=dn)
    y = y + b3[None, :, None, None]
    return jax.nn.sigmoid(y)


if __name__ == "__main__":
    key = jax.random.PRNGKey(0)
    kx, kp = jax.random.split(key)

    in_c, out_c, ndf = 3, 3, 8
    N, H, W = 2, 16, 16
    x = jax.random.normal(kx, (N, in_c + out_c, H, W), jnp.float32)
    params = init_params(kp, in_c, out_c, ndf)

    # tp=256 at this small size exercises multiple pixel tiles and the
    # two-slice (per-core) statistics path; realistic images use the
    # default tp=2048 (up to 8192 on v6e).
    fwd = jax.jit(functools.partial(discriminator_pixelgan_forward, tp=256))
    y = jax.block_until_ready(fwd(x, params))
    assert y.shape == (N, 1, H - 2, W - 2), y.shape

    ref = reference_forward(x, params)
    np.testing.assert_allclose(np.asarray(y), np.asarray(ref), atol=2e-2, rtol=2e-2)

    print("KERNEL_OK")
</pallas_src>

<mosaic_0001>
module attributes {stable_mosaic.version = 11 : i64} {
  func.func @_stats_kernel(%arg0: i32, %arg1: i32, %arg2: memref<256x64xbf16, #tpu.memory_space<vmem>>, %arg3: memref<64x128xbf16, #tpu.memory_space<vmem>>, %arg4: memref<1x128xf32, #tpu.memory_space<vmem>>, %arg5: memref<128x128xbf16, #tpu.memory_space<vmem>>, %arg6: memref<1x128xf32, #tpu.memory_space<vmem>>, %arg7: memref<1x256xf32, #tpu.memory_space<vmem>>) attributes {dimension_semantics = [#tpu.dimension_semantics<parallel>, #tpu.dimension_semantics<arbitrary>], iteration_bounds = array<i64: 2, 1>, scalar_prefetch = 0 : i64, scratch_operands = 0 : i64, tpu.core_type = #tpu.core_type<tc>, window_params = [{transform_indices = @transform_0, window_bounds = array<i64: 256, 64>}, {pipeline_mode = #tpu.pipeline_mode<synchronous>, transform_indices = @transform_1, window_bounds = array<i64: 64, 128>}, {pipeline_mode = #tpu.pipeline_mode<synchronous>, transform_indices = @transform_2, window_bounds = array<i64: 1, 128>}, {pipeline_mode = #tpu.pipeline_mode<synchronous>, transform_indices = @transform_3, window_bounds = array<i64: 128, 128>}, {pipeline_mode = #tpu.pipeline_mode<synchronous>, transform_indices = @transform_4, window_bounds = array<i64: 1, 128>}, {transform_indices = @transform_5, window_bounds = array<i64: 1, 256>}]} {
    %c0_i32 = arith.constant 0 : i32
    %0 = arith.cmpi eq, %arg1, %c0_i32 : i32
    %1 = arith.extui %0 : i1 to i32
    %c0_i32_0 = arith.constant 0 : i32
    %2 = arith.cmpi ne, %1, %c0_i32_0 : i32
    scf.if %2 {
      %cst_17 = arith.constant 0.000000e+00 : f32
      %34 = vector.broadcast %cst_17 : f32 to vector<1x256xf32>
      %c0_18 = arith.constant 0 : index
      %c0_19 = arith.constant 0 : index
      %35 = vector.load %arg7[%c0_18, %c0_19] : memref<1x256xf32, #tpu.memory_space<vmem>>, vector<1x256xf32>
      tpu.vector_store %arg7[%c0_18, %c0_19], %34 {strides = array<i32>} : memref<1x256xf32, #tpu.memory_space<vmem>>, vector<1x256xf32>,
    } else {
    }
    %c0 = arith.constant 0 : index
    %c0_1 = arith.constant 0 : index
    %3 = vector.load %arg2[%c0, %c0_1] : memref<256x64xbf16, #tpu.memory_space<vmem>>, vector<256x64xbf16>
    %c0_2 = arith.constant 0 : index
    %c0_3 = arith.constant 0 : index
    %4 = vector.load %arg3[%c0_2, %c0_3] : memref<64x128xbf16, #tpu.memory_space<vmem>>, vector<64x128xbf16>
    %cst = arith.constant dense<0.000000e+00> : vector<256x128xf32>
    %5 = tpu.matmul %3, %4, %cst {dimension_numbers = #tpu.dot_dimension_numbers<[1], [0], [0], [1], [0, 0, 1, 1], [], []>} : vector<256x64xbf16>, vector<64x128xbf16>, vector<256x128xf32> -> vector<256x128xf32>
    %c0_4 = arith.constant 0 : index
    %c0_5 = arith.constant 0 : index
    %6 = vector.load %arg4[%c0_4, %c0_5] : memref<1x128xf32, #tpu.memory_space<vmem>>, vector<1x128xf32>
    %7 = vector.broadcast %6 : vector<1x128xf32> to vector<256x128xf32>
    %8 = arith.addf %5, %7 : vector<256x128xf32>
    %cst_6 = arith.constant 2.000000e-01 : f32
    %9 = vector.broadcast %cst_6 : f32 to vector<256x128xf32>
    %10 = arith.mulf %9, %8 : vector<256x128xf32>
    %11 = arith.maximumf %8, %10 : vector<256x128xf32>
    %12 = arith.truncf %11 : vector<256x128xf32> to vector<256x128xbf16>
    %c0_7 = arith.constant 0 : index
    %c0_8 = arith.constant 0 : index
    %13 = vector.load %arg5[%c0_7, %c0_8] : memref<128x128xbf16, #tpu.memory_space<vmem>>, vector<128x128xbf16>
    %cst_9 = arith.constant dense<0.000000e+00> : vector<256x128xf32>
    %14 = tpu.matmul %12, %13, %cst_9 {dimension_numbers = #tpu.dot_dimension_numbers<[1], [0], [0], [1], [0, 0, 1, 1], [], []>} : vector<256x128xbf16>, vector<128x128xbf16>, vector<256x128xf32> -> vector<256x128xf32>
    %c0_10 = arith.constant 0 : index
    %c0_11 = arith.constant 0 : index
    %15 = vector.load %arg6[%c0_10, %c0_11] : memref<1x128xf32, #tpu.memory_space<vmem>>, vector<1x128xf32>
    %16 = vector.broadcast %15 : vector<1x128xf32> to vector<256x128xf32>
    %17 = arith.addf %14, %16 : vector<256x128xf32>
    %c1_i32 = arith.constant 1 : i32
    %18 = arith.muli %arg0, %c1_i32 : i32
    %19 = arith.addi %18, %arg1 : i32
    %c256_i32 = arith.constant 256 : i32
    %20 = arith.muli %19, %c256_i32 : i32
    %21 = tpu.iota {dimensions = array<i32: 1>} : vector<1x256xi32>
    %22 = vector.broadcast %20 : i32 to vector<1x256xi32>
    %23 = arith.addi %22, %21 : vector<1x256xi32>
    %c392_i32 = arith.constant 392 : i32
    %24 = vector.broadcast %c392_i32 : i32 to vector<1x256xi32>
    %25 = arith.cmpi slt, %23, %24 : vector<1x256xi32>
    %26 = arith.extui %25 : vector<1x256xi1> to vector<1x256xi32>
    %27 = arith.sitofp %26 : vector<1x256xi32> to vector<1x256xf32>
    %28 = arith.mulf %17, %17 : vector<256x128xf32>
    %29 = tpu.concatenate %17, %28 in 1 : vector<256x128xf32>, vector<256x128xf32> -> vector<256x256xf32>
    %c0_12 = arith.constant 0 : index
    %c0_13 = arith.constant 0 : index
    %30 = vector.load %arg7[%c0_12, %c0_13] : memref<1x256xf32, #tpu.memory_space<vmem>>, vector<1x256xf32>
    %cst_14 = arith.constant dense<0.000000e+00> : vector<1x256xf32>
    %31 = tpu.matmul %27, %29, %cst_14 {dimension_numbers = #tpu.dot_dimension_numbers<[1], [0], [0], [1], [0, 0, 1, 1], [], []>} : vector<1x256xf32>, vector<256x256xf32>, vector<1x256xf32> -> vector<1x256xf32>
    %32 = arith.addf %30, %31 : vector<1x256xf32>
    %c0_15 = arith.constant 0 : index
    %c0_16 = arith.constant 0 : index
    %33 = vector.load %arg7[%c0_15, %c0_16] : memref<1x256xf32, #tpu.memory_space<vmem>>, vector<1x256xf32>
    tpu.vector_store %arg7[%c0_15, %c0_16], %32 {strides = array<i32>} : memref<1x256xf32, #tpu.memory_space<vmem>>, vector<1x256xf32>,
    return
  }
  func.func @transform_0(%arg0: i32, %arg1: i32) -> (i32, i32) {
    %c1_i32 = arith.constant 1 : i32
    %0 = arith.muli %arg0, %c1_i32 : i32
    %1 = arith.addi %0, %arg1 : i32
    %c0_i32 = arith.constant 0 : i32
    %c0_i32_0 = arith.constant 0 : i32
    return %1, %c0_i32 : i32, i32
  }
  func.func @transform_1(%arg0: i32, %arg1: i32) -> (i32, i32) {
    %c0_i32 = arith.constant 0 : i32
    %c0_i32_0 = arith.constant 0 : i32
    %c0_i32_1 = arith.constant 0 : i32
    return %c0_i32, %c0_i32_0 : i32, i32
  }
  func.func @transform_2(%arg0: i32, %arg1: i32) -> (i32, i32) {
    %c0_i32 = arith.constant 0 : i32
    %c0_i32_0 = arith.constant 0 : i32
    %c0_i32_1 = arith.constant 0 : i32
    return %c0_i32, %c0_i32_0 : i32, i32
  }
  func.func @transform_3(%arg0: i32, %arg1: i32) -> (i32, i32) {
    %c0_i32 = arith.constant 0 : i32
    %c0_i32_0 = arith.constant 0 : i32
    %c0_i32_1 = arith.constant 0 : i32
    return %c0_i32, %c0_i32_0 : i32, i32
  }
  func.func @transform_4(%arg0: i32, %arg1: i32) -> (i32, i32) {
    %c0_i32 = arith.constant 0 : i32
    %c0_i32_0 = arith.constant 0 : i32
    %c0_i32_1 = arith.constant 0 : i32
    return %c0_i32, %c0_i32_0 : i32, i32
  }
  func.func @transform_5(%arg0: i32, %arg1: i32) -> (i32, i32) {
    %c0_i32 = arith.constant 0 : i32
    %c0_i32_0 = arith.constant 0 : i32
    return %c0_i32, %arg0 : i32, i32
  }
}

module attributes {stable_mosaic.version = 11 : i64} {
  func.func @_apply_kernel(%arg0: i32, %arg1: memref<256x64xbf16, #tpu.memory_space<vmem>>, %arg2: memref<64x128xbf16, #tpu.memory_space<vmem>>, %arg3: memref<1x128xf32, #tpu.memory_space<vmem>>, %arg4: memref<128x128xbf16, #tpu.memory_space<vmem>>, %arg5: memref<1x128xf32, #tpu.memory_space<vmem>>, %arg6: memref<1x128xf32, #tpu.memory_space<vmem>>, %arg7: memref<1x128xf32, #tpu.memory_space<vmem>>, %arg8: memref<1x128xbf16, #tpu.memory_space<vmem>>, %arg9: memref<1x256xbf16, #tpu.memory_space<vmem>>) attributes {dimension_semantics = [#tpu.dimension_semantics<parallel>], iteration_bounds = array<i64: 2>, scalar_prefetch = 0 : i64, scratch_operands = 0 : i64, tpu.core_type = #tpu.core_type<tc>, window_params = [{transform_indices = @transform_0, window_bounds = array<i64: 256, 64>}, {pipeline_mode = #tpu.pipeline_mode<synchronous>, transform_indices = @transform_1, window_bounds = array<i64: 64, 128>}, {pipeline_mode = #tpu.pipeline_mode<synchronous>, transform_indices = @transform_2, window_bounds = array<i64: 1, 128>}, {pipeline_mode = #tpu.pipeline_mode<synchronous>, transform_indices = @transform_3, window_bounds = array<i64: 128, 128>}, {pipeline_mode = #tpu.pipeline_mode<synchronous>, transform_indices = @transform_4, window_bounds = array<i64: 1, 128>}, {pipeline_mode = #tpu.pipeline_mode<synchronous>, transform_indices = @transform_5, window_bounds = array<i64: 1, 128>}, {pipeline_mode = #tpu.pipeline_mode<synchronous>, transform_indices = @transform_6, window_bounds = array<i64: 1, 128>}, {pipeline_mode = #tpu.pipeline_mode<synchronous>, transform_indices = @transform_7, window_bounds = array<i64: 1, 128>}, {transform_indices = @transform_8, window_bounds = array<i64: 1, 256>}]} {
    %c0 = arith.constant 0 : index
    %c0_0 = arith.constant 0 : index
    %0 = vector.load %arg1[%c0, %c0_0] : memref<256x64xbf16, #tpu.memory_space<vmem>>, vector<256x64xbf16>
    %c0_1 = arith.constant 0 : index
    %c0_2 = arith.constant 0 : index
    %1 = vector.load %arg2[%c0_1, %c0_2] : memref<64x128xbf16, #tpu.memory_space<vmem>>, vector<64x128xbf16>
    %cst = arith.constant dense<0.000000e+00> : vector<256x128xf32>
    %2 = tpu.matmul %0, %1, %cst {dimension_numbers = #tpu.dot_dimension_numbers<[1], [0], [0], [1], [0, 0, 1, 1], [], []>} : vector<256x64xbf16>, vector<64x128xbf16>, vector<256x128xf32> -> vector<256x128xf32>
    %c0_3 = arith.constant 0 : index
    %c0_4 = arith.constant 0 : index
    %3 = vector.load %arg3[%c0_3, %c0_4] : memref<1x128xf32, #tpu.memory_space<vmem>>, vector<1x128xf32>
    %4 = vector.broadcast %3 : vector<1x128xf32> to vector<256x128xf32>
    %5 = arith.addf %2, %4 : vector<256x128xf32>
    %cst_5 = arith.constant 2.000000e-01 : f32
    %6 = vector.broadcast %cst_5 : f32 to vector<256x128xf32>
    %7 = arith.mulf %6, %5 : vector<256x128xf32>
    %8 = arith.maximumf %5, %7 : vector<256x128xf32>
    %9 = arith.truncf %8 : vector<256x128xf32> to vector<256x128xbf16>
    %c0_6 = arith.constant 0 : index
    %c0_7 = arith.constant 0 : index
    %10 = vector.load %arg4[%c0_6, %c0_7] : memref<128x128xbf16, #tpu.memory_space<vmem>>, vector<128x128xbf16>
    %cst_8 = arith.constant dense<0.000000e+00> : vector<256x128xf32>
    %11 = tpu.matmul %9, %10, %cst_8 {dimension_numbers = #tpu.dot_dimension_numbers<[1], [0], [0], [1], [0, 0, 1, 1], [], []>} : vector<256x128xbf16>, vector<128x128xbf16>, vector<256x128xf32> -> vector<256x128xf32>
    %c0_9 = arith.constant 0 : index
    %c0_10 = arith.constant 0 : index
    %12 = vector.load %arg5[%c0_9, %c0_10] : memref<1x128xf32, #tpu.memory_space<vmem>>, vector<1x128xf32>
    %13 = vector.broadcast %12 : vector<1x128xf32> to vector<256x128xf32>
    %14 = arith.addf %11, %13 : vector<256x128xf32>
    %c0_11 = arith.constant 0 : index
    %c0_12 = arith.constant 0 : index
    %15 = vector.load %arg6[%c0_11, %c0_12] : memref<1x128xf32, #tpu.memory_space<vmem>>, vector<1x128xf32>
    %16 = vector.broadcast %15 : vector<1x128xf32> to vector<256x128xf32>
    %17 = arith.mulf %14, %16 : vector<256x128xf32>
    %c0_13 = arith.constant 0 : index
    %c0_14 = arith.constant 0 : index
    %18 = vector.load %arg7[%c0_13, %c0_14] : memref<1x128xf32, #tpu.memory_space<vmem>>, vector<1x128xf32>
    %19 = vector.broadcast %18 : vector<1x128xf32> to vector<256x128xf32>
    %20 = arith.addf %17, %19 : vector<256x128xf32>
    %cst_15 = arith.constant 2.000000e-01 : f32
    %21 = vector.broadcast %cst_15 : f32 to vector<256x128xf32>
    %22 = arith.mulf %21, %20 : vector<256x128xf32>
    %23 = arith.maximumf %20, %22 : vector<256x128xf32>
    %c0_16 = arith.constant 0 : index
    %c0_17 = arith.constant 0 : index
    %24 = vector.load %arg8[%c0_16, %c0_17] : memref<1x128xbf16, #tpu.memory_space<vmem>>, vector<1x128xbf16>
    %25 = arith.truncf %23 : vector<256x128xf32> to vector<256x128xbf16>
    %cst_18 = arith.constant dense<0.000000e+00> : vector<1x256xf32>
    %26 = tpu.matmul %24, %25, %cst_18 {dimension_numbers = #tpu.dot_dimension_numbers<[1], [1], [0], [0], [0, 0, 1, 0], [], []>} : vector<1x128xbf16>, vector<256x128xbf16>, vector<1x256xf32> -> vector<1x256xf32>
    %27 = math.absf %26 : vector<1x256xf32>
    %cst_19 = arith.constant 0.000000e+00 : f32
    %28 = vector.broadcast %cst_19 : f32 to vector<1x256xf32>
    %29 = arith.subf %28, %27 : vector<1x256xf32>
    %30 = math.exp %29 : vector<1x256xf32>
    %cst_20 = arith.constant 1.000000e+00 : f32
    %31 = vector.broadcast %cst_20 : f32 to vector<1x256xf32>
    %32 = arith.addf %31, %30 : vector<1x256xf32>
    %33 = tpu.reciprocal %32 {approx = true} : vector<1x256xf32> -> vector<1x256xf32>
    %cst_21 = arith.constant 0.000000e+00 : f32
    %34 = vector.broadcast %cst_21 : f32 to vector<1x256xf32>
    %35 = arith.cmpf oge, %26, %34 : vector<1x256xf32>
    %36 = arith.mulf %30, %33 : vector<1x256xf32>
    %37 = arith.select %35, %33, %36 : vector<1x256xi1>, vector<1x256xf32>
    %38 = arith.truncf %37 : vector<1x256xf32> to vector<1x256xbf16>
    %c0_22 = arith.constant 0 : index
    %c0_23 = arith.constant 0 : index
    %39 = vector.load %arg9[%c0_22, %c0_23] : memref<1x256xbf16, #tpu.memory_space<vmem>>, vector<1x256xbf16>
    tpu.vector_store %arg9[%c0_22, %c0_23], %38 {strides = array<i32>} : memref<1x256xbf16, #tpu.memory_space<vmem>>, vector<1x256xbf16>,
    return
  }
  func.func @transform_0(%arg0: i32) -> (i32, i32) {
    %c0_i32 = arith.constant 0 : i32
    %c0_i32_0 = arith.constant 0 : i32
    return %arg0, %c0_i32 : i32, i32
  }
  func.func @transform_1(%arg0: i32) -> (i32, i32) {
    %c0_i32 = arith.constant 0 : i32
    %c0_i32_0 = arith.constant 0 : i32
    %c0_i32_1 = arith.constant 0 : i32
    return %c0_i32, %c0_i32_0 : i32, i32
  }
  func.func @transform_2(%arg0: i32) -> (i32, i32) {
    %c0_i32 = arith.constant 0 : i32
    %c0_i32_0 = arith.constant 0 : i32
    %c0_i32_1 = arith.constant 0 : i32
    return %c0_i32, %c0_i32_0 : i32, i32
  }
  func.func @transform_3(%arg0: i32) -> (i32, i32) {
    %c0_i32 = arith.constant 0 : i32
    %c0_i32_0 = arith.constant 0 : i32
    %c0_i32_1 = arith.constant 0 : i32
    return %c0_i32, %c0_i32_0 : i32, i32
  }
  func.func @transform_4(%arg0: i32) -> (i32, i32) {
    %c0_i32 = arith.constant 0 : i32
    %c0_i32_0 = arith.constant 0 : i32
    %c0_i32_1 = arith.constant 0 : i32
    return %c0_i32, %c0_i32_0 : i32, i32
  }
  func.func @transform_5(%arg0: i32) -> (i32, i32) {
    %c0_i32 = arith.constant 0 : i32
    %c0_i32_0 = arith.constant 0 : i32
    %c0_i32_1 = arith.constant 0 : i32
    return %c0_i32, %c0_i32_0 : i32, i32
  }
  func.func @transform_6(%arg0: i32) -> (i32, i32) {
    %c0_i32 = arith.constant 0 : i32
    %c0_i32_0 = arith.constant 0 : i32
    %c0_i32_1 = arith.constant 0 : i32
    return %c0_i32, %c0_i32_0 : i32, i32
  }
  func.func @transform_7(%arg0: i32) -> (i32, i32) {
    %c0_i32 = arith.constant 0 : i32
    %c0_i32_0 = arith.constant 0 : i32
    %c0_i32_1 = arith.constant 0 : i32
    return %c0_i32, %c0_i32_0 : i32, i32
  }
  func.func @transform_8(%arg0: i32) -> (i32, i32) {
    %c0_i32 = arith.constant 0 : i32
    %c0_i32_0 = arith.constant 0 : i32
    return %c0_i32, %arg0 : i32, i32
  }
}

</mosaic_0001>

<bundles_post_ra>
// kernel: discriminator_pixelgan_forward.2
= control target key start
LH: loop header
LB: loop body
LE: loop exit
PB: predicated region body
PF: predicated region fallthrough
CT: control target
= control target key end

     0   :  { %s1498_s18 = smov 0   ;;  %s1500_s19 = smov 0   ;;  %s1688_s0 = inlined_call_operand.vmem [shape: bf16[512,64], index: 0, kind: input, shape index: {}]   ;;  %s1689_s1 = inlined_call_operand.vmem [shape: bf16[64,128], index: 1, kind: input, shape index: {}]   ;;  %s1690_s2 = inlined_call_operand.vmem [shape: f32[1,128], index: 2, kind: input, shape index: {}]   ;;  %s1691_s3 = inlined_call_operand.vmem [shape: bf16[128,128], index: 3, kind: input, shape index: {}]   ;;  %s1692_s4 = inlined_call_operand.vmem [shape: f32[1,128], index: 4, kind: input, shape index: {}]   ;;  %s1693_s5 = inlined_call_operand.vmem [shape: f32[1,512], index: 5, kind: output, shape index: {}]  }
   0x1   :  { %s1502_s20 = smov 0  }
   0x2 LB: > { %s27_s21 = sadd.s32 1, %s1459_s19  ;;  %p1133_p0 = scmp.ge.s32.totalorder %s1463_s20, 1  ;;  %s1463_s20 = sphi %s1502_s20, %s15_s20   ;;  %s1459_s19 = sphi %s1500_s19, %s1695_s19   ;;  %s1455_s18 = sphi %s1498_s18, %s1694_s18  }
   0x3   : > { %p29_p1 = scmp.ge.s32.totalorder %s27_s21, 2  ;;  %p204_p2 = scmp.lt.s32.totalorder %s1463_s20, 3 }
   0x5   : > { %s1697_s21 = smov (%p29_p1, %s27_s21), 0  ;;  %p205_p3 = pnand %p1133_p0, %p204_p2 }
   0x6   : > { %v1413_v0 = vld [vmem:[%s1689_s1] sm:$0xff] (!%p205_p3)   ;;  %s1134_s24 = sshll.u32 (!%p205_p3), %s1455_s18, 5  ;;  %v1414_v1 = vld [vmem:[%s1689_s1 + $0x8] sm:$0xff] (!%p205_p3)   ;;  %v1415_v2 = vld [vmem:[%s1689_s1 + $0x10] sm:$0xff] (!%p205_p3)   ;;  %vm406_vm0 = vcmask (!%p205_p3), 523264   ;;  %s1183_s7 = sshll.u32 (!%p205_p3), %s1455_s18, 8 }
   0x7   : > { %208 = sbr.rel (%p205_p3) target bundleno = 754 (0x2f2), region = 40  ;;  %p234_p4 = scmp.lt.s32.totalorder (!%p205_p3), %s1134_s24, 63  ;;  %1234 = vmatprep.subr.bf16.mxu0 (!%p205_p3), %v1413_v0  ;;  %v1433_v3 = vld [vmem:[%s1691_s3] sm:$0xff] (!%p205_p3)   ;;  %v1434_v4 = vld [vmem:[%s1691_s3 + $0x8] sm:$0xff] (!%p205_p3)   ;;  %v1416_v5 = vld [vmem:[%s1689_s1 + $0x18] sm:$0xff] (!%p205_p3)  }
   0x8   : > { %1235 = vmatpush3.bf16.msra.mxu0 (!%p205_p3), %v1413_v0  ;;  %1274 = vmatprep.subr.bf16.mxu1 (!%p205_p3), %v1433_v3  ;;  %v1435_v7 = vld [vmem:[%s1691_s3 + $0x10] sm:$0xff] (!%p205_p3)   ;;  %v1436_v12 = vld [vmem:[%s1691_s3 + $0x18] sm:$0xff] (!%p205_p3)   ;;  %v1437_v13 = vld [vmem:[%s1691_s3 + $0x20] sm:$0xff] (!%p205_p3)   ;;  %s1136_s10 = sshll.u32 (!%p205_p3), %s1455_s18, 1 }
   0x9   : > { %1236 = vmatprep.subr.bf16.mxu0 (!%p205_p3), %v1414_v1  ;;  %1275 = vmatpush3.bf16.msra.mxu1 (!%p205_p3), %v1433_v3  ;;  %v1438_v25 = vld [vmem:[%s1691_s3 + $0x28] sm:$0xff] (!%p205_p3)   ;;  %v1439_v26 = vld [vmem:[%s1691_s3 + $0x30] sm:$0xff] (!%p205_p3)   ;;  %v1440_v27 = vld [vmem:[%s1691_s3 + $0x38] sm:$0xff] (!%p205_p3)   ;;  %p241_p5 = scmp.lt.s32.totalorder (!%p205_p3), %s1136_s10, 3 }
   0xa   : > { %1276 = vmatprep.subr.bf16.mxu1 (!%p205_p3), %v1434_v4  ;;  %v1595_v28 = vld [vmem:[%s1690_s2] ss:$0 sm:$0xff] (!%p205_p3) }
   0xc   : > { %1237 = vmatpush3.bf16.msra.mxu0 (!%p205_p3), %v1414_v1 }
   0xd   : > { %1238 = vmatprep.subr.bf16.mxu0 (!%p205_p3), %v1415_v2  ;;  %1277 = vmatpush3.bf16.msra.mxu1 (!%p205_p3), %v1434_v4 }
   0xe   : > { %s1699_s24 = smov (!%p234_p4, %s1134_s24), 63  ;;  %1278 = vmatprep.subr.bf16.mxu1 %v1435_v7  ;;  %s1701_s10 = smov (!%p241_p5, %s1136_s10), 3 }
   0xf   : > { %s1135_s6 = sshll.u32 %s1699_s24, 2 }
  0x10   : > { %s1540_s13 = scalar_lea.vmem %s1688_s0, %s1135_s6  ;;  %1239 = vmatpush3.bf16.msra.mxu0 %v1415_v2 }
  0x11   : > { %v1417_v6 = vld [vmem:[%s1540_s13] sm:$0xff]   ;;  %1240 = vmatprep.subr.bf16.mxu0 %v1416_v5  ;;  %v1418_v8 = vld [vmem:[%s1540_s13 + $0x8] sm:$0xff]   ;;  %v1419_v9 = vld [vmem:[%s1540_s13 + $0x10] sm:$0xff]   ;;  %1279 = vmatpush3.bf16.msra.mxu1 %v1435_v7 }
  0x12   : > { %1242 = vmatprep.mubr.msk.bf16.mxu0 %vm406_vm0, %v1417_v6  ;;  %v1420_v10 = vld [vmem:[%s1540_s13 + $0x18] sm:$0xff]   ;;  %v1421_v11 = vld [vmem:[%s1540_s13 + $0x20] sm:$0xff]   ;;  %1280 = vmatprep.subr.bf16.mxu1 %v1436_v12  ;;  %v1422_v14 = vld [vmem:[%s1540_s13 + $0x28] sm:$0xff]  }
  0x13   : > { %v1423_v15 = vld [vmem:[%s1540_s13 + $0x30] sm:$0xff]   ;;  %v1424_v16 = vld [vmem:[%s1540_s13 + $0x38] sm:$0xff]   ;;  %v1425_v17 = vld [vmem:[%s1540_s13 + $0x40] sm:$0xff]  }
  0x14   : > { %1241 = vmatpush3.bf16.msra.mxu0 %v1416_v5  ;;  %v1426_v18 = vld [vmem:[%s1540_s13 + $0x48] sm:$0xff]   ;;  %v1427_v19 = vld [vmem:[%s1540_s13 + $0x50] sm:$0xff]   ;;  %v1428_v20 = vld [vmem:[%s1540_s13 + $0x58] sm:$0xff]  }
  0x15   : > { %1281 = vmatpush3.bf16.msra.mxu1 %v1436_v12  ;;  %v1429_v21 = vld [vmem:[%s1540_s13 + $0x60] sm:$0xff]   ;;  %v1430_v22 = vld [vmem:[%s1540_s13 + $0x68] sm:$0xff]   ;;  %v1431_v23 = vld [vmem:[%s1540_s13 + $0x70] sm:$0xff]  }
  0x16   : > { %1282 = vmatprep.subr.bf16.mxu1 %v1437_v13  ;;  %v1432_v24 = vld [vmem:[%s1540_s13 + $0x78] sm:$0xff]   ;;  %s243_s13 = scalar_lea.vmem %s1693_s5, %s1701_s10 }
  0x17   : > { %1243 = vmatmul.mubr.msk.bf16.vlgmr.msra.gmra.mrb[0].mxu0 %vm406_vm0, %v1418_v8 }
  0x18   : > { %1246 = vmatprep.mubr.msk.bf16.mxu0 %vm406_vm0, %v1419_v9 }
  0x19   : > { %1283 = vmatpush3.bf16.msra.mxu1 %v1437_v13 }
  0x1a   : > { %1284 = vmatprep.subr.bf16.mxu1 %v1438_v25 }
  0x1d   : > { %1285 = vmatpush3.bf16.msra.mxu1 %v1438_v25 }
  0x1e   : > { %1286 = vmatprep.subr.bf16.mxu1 %v1439_v26 }
  0x1f   : > { %1247 = vmatmul.mubr.msk.bf16.gmra.mrb[4].mxu0 %vm406_vm0, %v1420_v10 }
  0x20   : > { %1250 = vmatprep.mubr.msk.bf16.mxu0 %vm406_vm0, %v1421_v11 }
  0x21   : > { %1287 = vmatpush3.bf16.msra.mxu1 %v1439_v26 }
  0x22   : > { %1288 = vmatprep.subr.bf16.mxu1 %v1440_v27 }
  0x25   : > { %1289 = vmatpush3.bf16.msra.mxu1 %v1440_v27 }
  0x27   : > { %1251 = vmatmul.mubr.msk.bf16.gmra.mrb[8].mxu0 %vm406_vm0, %v1422_v14 }
  0x28   : > { %1254 = vmatprep.mubr.msk.bf16.mxu0 %vm406_vm0, %v1423_v15 }
  0x2f   : > { %1255 = vmatmul.mubr.msk.bf16.gmra.mrb[12].mxu0 %vm406_vm0, %v1424_v16 }
  0x30   : > { %1258 = vmatprep.mubr.msk.bf16.mxu0 %vm406_vm0, %v1425_v17 }
  0x37   : > { %1259 = vmatmul.mubr.msk.bf16.gmra.mrb[16].mxu0 %vm406_vm0, %v1426_v18 }
  0x38   : > { %1262 = vmatprep.mubr.msk.bf16.mxu0 %vm406_vm0, %v1427_v19 }
  0x3f   : > { %1263 = vmatmul.mubr.msk.bf16.gmra.mrb[20].mxu0 %vm406_vm0, %v1428_v20 }
  0x40   : > { %1266 = vmatprep.mubr.msk.bf16.mxu0 %vm406_vm0, %v1429_v21 }
  0x47   : > { %1267 = vmatmul.mubr.msk.bf16.gmra.mrb[24].mxu0 %vm406_vm0, %v1430_v22 }
  0x48   : > { %1270 = vmatprep.mubr.msk.bf16.mxu0 %vm406_vm0, %v1431_v23 }
  0x4f   : > { %1271 = vmatmul.mubr.msk.bf16.gmra.mrb[28].mxu0 %vm406_vm0, %v1432_v24 }
  0xea   : > { %v1244_v29 = vpop.f32.mrb[0].mxu0 }
  0xeb   : > { %v498_v30 = vadd.f32 %v1244_v29, %v1595_v28  ;;  %v489_v31 = vpop.f32.mrb[1].mxu0 }
  0xec   : > { %v490_v32 = vadd.f32 %v1595_v28, %v489_v31  ;;  %v1245_v33 = vpop.f32.mrb[2].mxu0 }
  0xed   : > { %v618_v34 = vmul.f32 0.2, %v498_v30  ;;  %v501_v35 = vadd.f32 %v1245_v33, %v1595_v28  ;;  %v492_v36 = vpop.f32.mrb[3].mxu0 }
  0xee   : > { %v616_v37 = vmul.f32 0.2, %v490_v32  ;;  %v493_v38 = vadd.f32 %v1595_v28, %v492_v36 }
  0xef   : > { %v619_v39 = vmul.f32 0.2, %v501_v35  ;;  %v650_v41 = vmax.f32 %v498_v30, %v618_v34 }
  0xf0   : > { %v617_v40 = vmul.f32 0.2, %v493_v38  ;;  %v648_v44 = vmax.f32 %v490_v32, %v616_v37 }
  0xf1   : > { %v651_v42 = vmax.f32 %v501_v35, %v619_v39 }
  0xf2   : > { %v1248_v43 = vpop.f32.mrb[4].mxu0  ;;  %v649_v45 = vmax.f32 %v493_v38, %v617_v40 }
  0xf3   : > { %v514_v46 = vadd.f32 %v1248_v43, %v1595_v28  ;;  %v505_v47 = vpop.f32.mrb[5].mxu0  ;;  %v681_v48 = vpack.c.bf16 %v651_v42, %v650_v41 }
  0xf4   : > { %v506_v49 = vadd.f32 %v1595_v28, %v505_v47  ;;  %v1249_v50 = vpop.f32.mrb[6].mxu0  ;;  %v680_v51 = vpack.c.bf16 %v649_v45, %v648_v44 }
  0xf5   : > { %v622_v52 = vmul.f32 0.2, %v514_v46  ;;  %v517_v53 = vadd.f32 %v1249_v50, %v1595_v28  ;;  %v508_v54 = vpop.f32.mrb[7].mxu0 }
  0xf6   : > { %v620_v55 = vmul.f32 0.2, %v506_v49  ;;  %v509_v56 = vadd.f32 %v1595_v28, %v508_v54  ;;  %1290 = vmatprep.mubr.bf16.mxu1 %v680_v51 }
  0xf7   : > { %v623_v57 = vmul.f32 0.2, %v517_v53  ;;  %1291 = vmatmul.mubr.bf16.vlgmr.msra.gmra.mrb[0].mxu1 %v681_v48  ;;  %v654_v59 = vmax.f32 %v514_v46, %v622_v52 }
  0xf8   : > { %v621_v58 = vmul.f32 0.2, %v509_v56  ;;  %v652_v61 = vmax.f32 %v506_v49, %v620_v55 }
  0xf9   : > { %v655_v60 = vmax.f32 %v517_v53, %v623_v57 }
  0xfa   : > { %v653_v62 = vmax.f32 %v509_v56, %v621_v58  ;;  %v1252_v63 = vpop.f32.mrb[8].mxu0 }
  0xfb   : > { %v530_v0 = vadd.f32 %v1252_v63, %v1595_v28  ;;  %v521_v1 = vpop.f32.mrb[9].mxu0  ;;  %v683_v2 = vpack.c.bf16 %v655_v60, %v654_v59 }
  0xfc   : > { %v522_v3 = vadd.f32 %v1595_v28, %v521_v1  ;;  %v1253_v4 = vpop.f32.mrb[10].mxu0  ;;  %v682_v5 = vpack.c.bf16 %v653_v62, %v652_v61 }
  0xfd   : > { %v626_v6 = vmul.f32 0.2, %v530_v0  ;;  %v533_v7 = vadd.f32 %v1253_v4, %v1595_v28  ;;  %v524_v8 = vpop.f32.mrb[11].mxu0 }
  0xfe   : > { %v624_v9 = vmul.f32 0.2, %v522_v3  ;;  %v525_v10 = vadd.f32 %v1595_v28, %v524_v8  ;;  %1294 = vmatprep.mubr.bf16.mxu1 %v682_v5 }
  0xff   : > { %v627_v11 = vmul.f32 0.2, %v533_v7  ;;  %1295 = vmatmul.mubr.bf16.gmra.mrb[4].mxu1 %v683_v2  ;;  %v658_v13 = vmax.f32 %v530_v0, %v626_v6 }
 0x100   : > { %v625_v12 = vmul.f32 0.2, %v525_v10  ;;  %v656_v15 = vmax.f32 %v522_v3, %v624_v9 }
 0x101   : > { %v659_v14 = vmax.f32 %v533_v7, %v627_v11 }
 0x102   : > { %v657_v16 = vmax.f32 %v525_v10, %v625_v12  ;;  %v1256_v17 = vpop.f32.mrb[12].mxu0 }
 0x103   : > { %v546_v18 = vadd.f32 %v1256_v17, %v1595_v28  ;;  %v537_v19 = vpop.f32.mrb[13].mxu0  ;;  %v685_v20 = vpack.c.bf16 %v659_v14, %v658_v13 }
 0x104   : > { %v538_v21 = vadd.f32 %v1595_v28, %v537_v19  ;;  %v1257_v22 = vpop.f32.mrb[14].mxu0  ;;  %v684_v23 = vpack.c.bf16 %v657_v16, %v656_v15 }
 0x105   : > { %v630_v24 = vmul.f32 0.2, %v546_v18  ;;  %v549_v25 = vadd.f32 %v1257_v22, %v1595_v28  ;;  %v540_v26 = vpop.f32.mrb[15].mxu0 }
 0x106   : > { %v628_v27 = vmul.f32 0.2, %v538_v21  ;;  %v541_v29 = vadd.f32 %v1595_v28, %v540_v26  ;;  %1298 = vmatprep.mubr.bf16.mxu1 %v684_v23 }
 0x107   : > { %v631_v30 = vmul.f32 0.2, %v549_v25  ;;  %1299 = vmatmul.mubr.bf16.gmra.mrb[8].mxu1 %v685_v20  ;;  %v662_v32 = vmax.f32 %v546_v18, %v630_v24 }
 0x108   : > { %v629_v31 = vmul.f32 0.2, %v541_v29  ;;  %v660_v34 = vmax.f32 %v538_v21, %v628_v27 }
 0x109   : > { %v663_v33 = vmax.f32 %v549_v25, %v631_v30 }
 0x10a   : > { %v661_v35 = vmax.f32 %v541_v29, %v629_v31  ;;  %v1260_v36 = vpop.f32.mrb[16].mxu0 }
 0x10b   : > { %v562_v37 = vadd.f32 %v1260_v36, %v1595_v28  ;;  %v553_v38 = vpop.f32.mrb[17].mxu0  ;;  %v687_v39 = vpack.c.bf16 %v663_v33, %v662_v32 }
 0x10c   : > { %v554_v40 = vadd.f32 %v1595_v28, %v553_v38  ;;  %v1261_v41 = vpop.f32.mrb[18].mxu0  ;;  %v686_v42 = vpack.c.bf16 %v661_v35, %v660_v34 }
 0x10d   : > { %v634_v43 = vmul.f32 0.2, %v562_v37  ;;  %v565_v44 = vadd.f32 %v1261_v41, %v1595_v28  ;;  %v556_v45 = vpop.f32.mrb[19].mxu0 }
 0x10e   : > { %v632_v46 = vmul.f32 0.2, %v554_v40  ;;  %v557_v47 = vadd.f32 %v1595_v28, %v556_v45  ;;  %1302 = vmatprep.mubr.bf16.mxu1 %v686_v42 }
 0x10f   : > { %v635_v48 = vmul.f32 0.2, %v565_v44  ;;  %1303 = vmatmul.mubr.bf16.gmra.mrb[12].mxu1 %v687_v39  ;;  %v666_v50 = vmax.f32 %v562_v37, %v634_v43 }
 0x110   : > { %v633_v49 = vmul.f32 0.2, %v557_v47  ;;  %v664_v52 = vmax.f32 %v554_v40, %v632_v46 }
 0x111   : > { %v667_v51 = vmax.f32 %v565_v44, %v635_v48 }
 0x112   : > { %v665_v53 = vmax.f32 %v557_v47, %v633_v49  ;;  %v1264_v54 = vpop.f32.mrb[20].mxu0  ;;  %v250_v47 = vlaneseq }
 0x113   : > { %v578_v55 = vadd.f32 %v1264_v54, %v1595_v28  ;;  %v569_v56 = vpop.f32.mrb[21].mxu0  ;;  %v689_v57 = vpack.c.bf16 %v667_v51, %v666_v50  ;;  %v933_v50 = vstv %s1183_s7 }
 0x114   : > { %v570_v58 = vadd.f32 %v1595_v28, %v569_v56  ;;  %v1265_v59 = vpop.f32.mrb[22].mxu0  ;;  %v688_v60 = vpack.c.bf16 %v665_v53, %v664_v52  ;;  %v931_v48 = vand.u32 127, %v250_v47  ;;  %v1465_v52 = vmov 1.0   ;;  %v1637_v53 = vld [vmem:[%s1692_s4] ss:$0 sm:$0xff] }
 0x115   : > { %v638_v61 = vmul.f32 0.2, %v578_v55  ;;  %v581_v62 = vadd.f32 %v1265_v59, %v1595_v28  ;;  %v572_v63 = vpop.f32.mrb[23].mxu0  ;;  %vm252_vm3 = vcmp.lt.s32.totalorder %v250_v47, 256 }
 0x116   : > { %v636_v0 = vmul.f32 0.2, %v570_v58  ;;  %v573_v1 = vadd.f32 %v1595_v28, %v572_v63  ;;  %1306 = vmatprep.mubr.bf16.mxu1 %v688_v60  ;;  %v932_v49 = vadd.s32 128, %v931_v48 }
 0x117   : > { %v639_v2 = vmul.f32 0.2, %v581_v62  ;;  %1307 = vmatmul.mubr.bf16.gmra.mrb[16].mxu1 %v689_v57  ;;  %v670_v4 = vmax.f32 %v578_v55, %v638_v61 }
 0x118   : > { %v637_v3 = vmul.f32 0.2, %v573_v1  ;;  %v668_v6 = vmax.f32 %v570_v58, %v636_v0  ;;  %v935_v51 = vadd.s32 %v933_v50, %v932_v49 }
 0x119   : > { %v671_v5 = vmax.f32 %v581_v62, %v639_v2 }
 0x11a   : > { %v669_v7 = vmax.f32 %v573_v1, %v637_v3  ;;  %v1268_v8 = vpop.f32.mrb[24].mxu0  ;;  %vm937_vm1 = vcmp.lt.s32.totalorder %v935_v51, 392 }
 0x11b   : > { %v594_v9 = vadd.f32 %v1268_v8, %v1595_v28  ;;  %v585_v10 = vpop.f32.mrb[25].mxu0  ;;  %v691_v11 = vpack.c.bf16 %v671_v5, %v670_v4  ;;  %1186 = vmatprep.mubr.msk.f32.mxu0 %vm937_vm1, %v1465_v52 }
 0x11c   : > { %v586_v12 = vadd.f32 %v1595_v28, %v585_v10  ;;  %v1269_v13 = vpop.f32.mrb[26].mxu0  ;;  %v690_v14 = vpack.c.bf16 %v669_v7, %v668_v6 }
 0x11d   : > { %v642_v15 = vmul.f32 0.2, %v594_v9  ;;  %v597_v16 = vadd.f32 %v1269_v13, %v1595_v28  ;;  %v588_v17 = vpop.f32.mrb[27].mxu0 }
 0x11e   : > { %v640_v18 = vmul.f32 0.2, %v586_v12  ;;  %v589_v19 = vadd.f32 %v1595_v28, %v588_v17  ;;  %1310 = vmatprep.mubr.bf16.mxu1 %v690_v14 }
 0x11f   : > { %v643_v20 = vmul.f32 0.2, %v597_v16  ;;  %1311 = vmatmul.mubr.bf16.gmra.mrb[20].mxu1 %v691_v11  ;;  %v674_v22 = vmax.f32 %v594_v9, %v642_v15 }
 0x120   : > { %v641_v21 = vmul.f32 0.2, %v589_v19  ;;  %v672_v24 = vmax.f32 %v586_v12, %v640_v18 }
 0x121   : > { %v675_v23 = vmax.f32 %v597_v16, %v643_v20 }
 0x122   : > { %v673_v25 = vmax.f32 %v589_v19, %v641_v21  ;;  %v1272_v26 = vpop.f32.mrb[28].mxu0 }
 0x123   : > { %v610_v27 = vadd.f32 %v1272_v26, %v1595_v28  ;;  %v601_v29 = vpop.f32.mrb[29].mxu0  ;;  %v693_v30 = vpack.c.bf16 %v675_v23, %v674_v22 }
 0x124   : > { %v602_v31 = vadd.f32 %v1595_v28, %v601_v29  ;;  %v1273_v32 = vpop.f32.mrb[30].mxu0  ;;  %v692_v33 = vpack.c.bf16 %v673_v25, %v672_v24 }
 0x125   : > { %v646_v34 = vmul.f32 0.2, %v610_v27  ;;  %v613_v35 = vadd.f32 %v1273_v32, %v1595_v28  ;;  %v604_v36 = vpop.f32.mrb[31].mxu0 }
 0x126   : > { %v644_v37 = vmul.f32 0.2, %v602_v31  ;;  %v605_v38 = vadd.f32 %v1595_v28, %v604_v36  ;;  %1314 = vmatprep.mubr.bf16.mxu1 %v692_v33  ;;  %v1631_v28 = vadd.s32 %v933_v50, %v931_v48 }
 0x127   : > { %v647_v39 = vmul.f32 0.2, %v613_v35  ;;  %1315 = vmatmul.mubr.bf16.gmra.mrb[24].mxu1 %v693_v30  ;;  %v678_v41 = vmax.f32 %v610_v27, %v646_v34 }
 0x128   : > { %v645_v40 = vmul.f32 0.2, %v605_v38  ;;  %v676_v43 = vmax.f32 %v602_v31, %v644_v37  ;;  %vm936_vm2 = vcmp.lt.s32.totalorder %v1631_v28, 392 }
 0x129   : > { %v679_v42 = vmax.f32 %v613_v35, %v647_v39 }
 0x12a   : > { %v677_v44 = vmax.f32 %v605_v38, %v645_v40 }
 0x12b   : > { %v695_v45 = vpack.c.bf16 %v679_v42, %v678_v41 }
 0x12c   : > { %v694_v46 = vpack.c.bf16 %v677_v44, %v676_v43 }
 0x12e   : > { %1318 = vmatprep.mubr.bf16.mxu1 %v694_v46 }
 0x12f   : > { %1319 = vmatmul.mubr.bf16.gmra.mrb[28].mxu1 %v695_v45 }
 0x1ca   : > { %v1292_v54 = vpop.f32.mrb[0].mxu1 }
 0x1cb   : > { %v810_v55 = vadd.f32 %v1292_v54, %v1637_v53  ;;  %v801_v56 = vpop.f32.mrb[1].mxu1 }
 0x1cc   : > { %v802_v57 = vadd.f32 %v1637_v53, %v801_v56  ;;  %v1293_v58 = vpop.f32.mrb[2].mxu1 }
 0x1cd   : > { %v813_v59 = vadd.f32 %v1293_v58, %v1637_v53  ;;  %v804_v60 = vpop.f32.mrb[3].mxu1  ;;  %v944_v62 = vmul.f32 %v810_v55, %v810_v55 }
 0x1ce   : > { %v805_v61 = vadd.f32 %v1637_v53, %v804_v60  ;;  %v942_v1 = vmul.f32 %v802_v57, %v802_v57 }
 0x1cf   : > { %v945_v63 = vmul.f32 %v813_v59, %v813_v59  ;;  %v1328_v0 = vpack.c.bf16 %v813_v59, %v810_v55 }
 0x1d0   : > { %v943_v2 = vmul.f32 %v805_v61, %v805_v61  ;;  %v1324_v3 = vpack.c.bf16 %v805_v61, %v802_v57 }
 0x1d1   : > { %v1326_v4 = vpack.c.bf16 %v945_v63, %v944_v62 }
 0x1d2   : > { %v1296_v5 = vpop.f32.mrb[4].mxu1  ;;  %v1322_v6 = vpack.c.bf16 %v943_v2, %v942_v1 }
 0x1d3   : > { %v826_v7 = vadd.f32 %v1296_v5, %v1637_v53  ;;  %v817_v8 = vpop.f32.mrb[5].mxu1 }
 0x1d4   : > { %v818_v9 = vadd.f32 %v1637_v53, %v817_v8  ;;  %v1297_v10 = vpop.f32.mrb[6].mxu1  ;;  %1323 = vmatprep.subr.bf16.mxu0 %v1322_v6 }
 0x1d5   : > { %v829_v11 = vadd.f32 %v1297_v10, %v1637_v53  ;;  %v820_v12 = vpop.f32.mrb[7].mxu1  ;;  %1325 = vmatpush1.bf16.msra.mxu0 %v1324_v3  ;;  %v948_v14 = vmul.f32 %v826_v7, %v826_v7 }
 0x1d6   : > { %v821_v13 = vadd.f32 %v1637_v53, %v820_v12  ;;  %1327 = vmatprep.subr.bf16.mxu0 %v1326_v4  ;;  %v946_v17 = vmul.f32 %v818_v9, %v818_v9 }
 0x1d7   : > { %v949_v15 = vmul.f32 %v829_v11, %v829_v11  ;;  %v1336_v16 = vpack.c.bf16 %v829_v11, %v826_v7 }
 0x1d8   : > { %v947_v18 = vmul.f32 %v821_v13, %v821_v13  ;;  %v1332_v19 = vpack.c.bf16 %v821_v13, %v818_v9 }
 0x1d9   : > { %1329 = vmatpush1.bf16.msra.mxu0 %v1328_v0  ;;  %v1334_v20 = vpack.c.bf16 %v949_v15, %v948_v14 }
 0x1da   : > { %v1300_v21 = vpop.f32.mrb[8].mxu1  ;;  %v1330_v22 = vpack.c.bf16 %v947_v18, %v946_v17 }
 0x1db   : > { %v842_v23 = vadd.f32 %v1300_v21, %v1637_v53  ;;  %v833_v24 = vpop.f32.mrb[9].mxu1 }
 0x1dc   : > { %v834_v25 = vadd.f32 %v1637_v53, %v833_v24  ;;  %v1301_v26 = vpop.f32.mrb[10].mxu1  ;;  %1331 = vmatprep.subr.bf16.mxu0 %v1330_v22 }
 0x1dd   : > { %v845_v27 = vadd.f32 %v1301_v26, %v1637_v53  ;;  %v836_v29 = vpop.f32.mrb[11].mxu1  ;;  %1333 = vmatpush1.bf16.msra.mxu0 %v1332_v19  ;;  %v952_v31 = vmul.f32 %v842_v23, %v842_v23 }
 0x1de   : > { %v837_v30 = vadd.f32 %v1637_v53, %v836_v29  ;;  %1335 = vmatprep.subr.bf16.mxu0 %v1334_v20  ;;  %v950_v34 = vmul.f32 %v834_v25, %v834_v25 }
 0x1df   : > { %v953_v32 = vmul.f32 %v845_v27, %v845_v27  ;;  %v1344_v33 = vpack.c.bf16 %v845_v27, %v842_v23 }
 0x1e0   : > { %v951_v35 = vmul.f32 %v837_v30, %v837_v30  ;;  %v1340_v36 = vpack.c.bf16 %v837_v30, %v834_v25 }
 0x1e1   : > { %1337 = vmatpush1.bf16.msra.mxu0 %v1336_v16  ;;  %v1342_v37 = vpack.c.bf16 %v953_v32, %v952_v31 }
 0x1e2   : > { %v1304_v38 = vpop.f32.mrb[12].mxu1  ;;  %v1338_v39 = vpack.c.bf16 %v951_v35, %v950_v34 }
 0x1e3   : > { %v858_v40 = vadd.f32 %v1304_v38, %v1637_v53  ;;  %v849_v41 = vpop.f32.mrb[13].mxu1 }
 0x1e4   : > { %v850_v42 = vadd.f32 %v1637_v53, %v849_v41  ;;  %v1305_v43 = vpop.f32.mrb[14].mxu1  ;;  %1339 = vmatprep.subr.bf16.mxu0 %v1338_v39 }
 0x1e5   : > { %v861_v44 = vadd.f32 %v1305_v43, %v1637_v53  ;;  %v852_v45 = vpop.f32.mrb[15].mxu1  ;;  %1341 = vmatpush1.bf16.msra.mxu0 %v1340_v36  ;;  %v956_v48 = vmul.f32 %v858_v40, %v858_v40 }
 0x1e6   : > { %v853_v46 = vadd.f32 %v1637_v53, %v852_v45  ;;  %1343 = vmatprep.subr.bf16.mxu0 %v1342_v37  ;;  %v954_v51 = vmul.f32 %v850_v42, %v850_v42 }
 0x1e7   : > { %v957_v49 = vmul.f32 %v861_v44, %v861_v44  ;;  %v1352_v50 = vpack.c.bf16 %v861_v44, %v858_v40 }
 0x1e8   : > { %v955_v54 = vmul.f32 %v853_v46, %v853_v46  ;;  %v1348_v55 = vpack.c.bf16 %v853_v46, %v850_v42 }
 0x1e9   : > { %1345 = vmatpush1.bf16.msra.mxu0 %v1344_v33  ;;  %v1350_v56 = vpack.c.bf16 %v957_v49, %v956_v48 }
 0x1ea   : > { %v1308_v57 = vpop.f32.mrb[16].mxu1  ;;  %v1346_v58 = vpack.c.bf16 %v955_v54, %v954_v51 }
 0x1eb   : > { %v874_v59 = vadd.f32 %v1308_v57, %v1637_v53  ;;  %v865_v60 = vpop.f32.mrb[17].mxu1 }
 0x1ec   : > { %v866_v61 = vadd.f32 %v1637_v53, %v865_v60  ;;  %v1309_v62 = vpop.f32.mrb[18].mxu1  ;;  %1347 = vmatprep.subr.bf16.mxu0 %v1346_v58 }
 0x1ed   : > { %v877_v63 = vadd.f32 %v1309_v62, %v1637_v53  ;;  %v868_v0 = vpop.f32.mrb[19].mxu1  ;;  %1349 = vmatpush1.bf16.msra.mxu0 %v1348_v55  ;;  %v960_v2 = vmul.f32 %v874_v59, %v874_v59  ;;  %v1467_v62 = vmov 1966171168  }
 0x1ee   : > { %v869_v1 = vadd.f32 %v1637_v53, %v868_v0  ;;  %1351 = vmatprep.subr.bf16.mxu0 %v1350_v56  ;;  %v958_v5 = vmul.f32 %v866_v61, %v866_v61 }
 0x1ef   : > { %v961_v3 = vmul.f32 %v877_v63, %v877_v63  ;;  %v1360_v4 = vpack.c.bf16 %v877_v63, %v874_v59  ;;  %v1050_v63 = vunpack.c.l.s4 %v1467_v62 }
 0x1f0   : > { %v959_v6 = vmul.f32 %v869_v1, %v869_v1  ;;  %v1356_v7 = vpack.c.bf16 %v869_v1, %v866_v61  ;;  %v1053_v1 = vshrl.u32 %v250_v47, 7 }
 0x1f1   : > { %1353 = vmatpush1.bf16.msra.mxu0 %v1352_v50  ;;  %v1358_v8 = vpack.c.bf16 %v961_v3, %v960_v2  ;;  %v1051_v0 = vunpack.c.0.s8 %v1050_v63 }
 0x1f2   : > { %v1312_v9 = vpop.f32.mrb[20].mxu1  ;;  %v1354_v10 = vpack.c.bf16 %v959_v6, %v958_v5 }
 0x1f3   : > { %v890_v11 = vadd.f32 %v1312_v9, %v1637_v53  ;;  %v881_v12 = vpop.f32.mrb[21].mxu1  ;;  %v1054_v28 = vsub.s32 %v1051_v0, %v1053_v1 }
 0x1f4   : > { %v882_v13 = vadd.f32 %v1637_v53, %v881_v12  ;;  %v1313_v14 = vpop.f32.mrb[22].mxu1  ;;  %1355 = vmatprep.subr.bf16.mxu0 %v1354_v10 }
 0x1f5   : > { %v893_v15 = vadd.f32 %v1313_v14, %v1637_v53  ;;  %v884_v16 = vpop.f32.mrb[23].mxu1  ;;  %1357 = vmatpush1.bf16.msra.mxu0 %v1356_v7  ;;  %v964_v18 = vmul.f32 %v890_v11, %v890_v11 }
 0x1f6   : > { %v885_v17 = vadd.f32 %v1637_v53, %v884_v16  ;;  %1359 = vmatprep.subr.bf16.mxu0 %v1358_v8  ;;  %v962_v21 = vmul.f32 %v882_v13, %v882_v13 }
 0x1f7   : > { %v965_v19 = vmul.f32 %v893_v15, %v893_v15  ;;  %v1368_v20 = vpack.c.bf16 %v893_v15, %v890_v11 }
 0x1f8   : > { %v963_v22 = vmul.f32 %v885_v17, %v885_v17  ;;  %v1364_v23 = vpack.c.bf16 %v885_v17, %v882_v13 }
 0x1f9   : > { %1361 = vmatpush1.bf16.msra.mxu0 %v1360_v4  ;;  %v1366_v24 = vpack.c.bf16 %v965_v19, %v964_v18 }
 0x1fa   : > { %v1316_v25 = vpop.f32.mrb[24].mxu1  ;;  %v1362_v26 = vpack.c.bf16 %v963_v22, %v962_v21 }
 0x1fb   : > { %v906_v27 = vadd.f32 %v1316_v25, %v1637_v53  ;;  %v897_v29 = vpop.f32.mrb[25].mxu1 }
 0x1fc   : > { %v898_v30 = vadd.f32 %v1637_v53, %v897_v29  ;;  %v1317_v31 = vpop.f32.mrb[26].mxu1  ;;  %1363 = vmatprep.subr.bf16.mxu0 %v1362_v26 }
 0x1fd   : > { %v909_v32 = vadd.f32 %v1317_v31, %v1637_v53  ;;  %v900_v33 = vpop.f32.mrb[27].mxu1  ;;  %1365 = vmatpush1.bf16.msra.mxu0 %v1364_v23  ;;  %v968_v35 = vmul.f32 %v906_v27, %v906_v27 }
 0x1fe   : > { %v901_v34 = vadd.f32 %v1637_v53, %v900_v33  ;;  %1367 = vmatprep.subr.bf16.mxu0 %v1366_v24  ;;  %v966_v38 = vmul.f32 %v898_v30, %v898_v30 }
 0x1ff   : > { %v969_v36 = vmul.f32 %v909_v32, %v909_v32  ;;  %v1376_v37 = vpack.c.bf16 %v909_v32, %v906_v27 }
 0x200   : > { %v967_v39 = vmul.f32 %v901_v34, %v901_v34  ;;  %v1372_v40 = vpack.c.bf16 %v901_v34, %v898_v30 }
 0x201   : > { %1369 = vmatpush1.bf16.msra.mxu0 %v1368_v20  ;;  %v1374_v41 = vpack.c.bf16 %v969_v36, %v968_v35 }
 0x202   : > { %v1320_v42 = vpop.f32.mrb[28].mxu1  ;;  %v1370_v43 = vpack.c.bf16 %v967_v39, %v966_v38 }
 0x203   : > { %v922_v44 = vadd.f32 %v1320_v42, %v1637_v53  ;;  %v913_v45 = vpop.f32.mrb[29].mxu1 }
 0x204   : > { %v914_v46 = vadd.f32 %v1637_v53, %v913_v45  ;;  %v1321_v48 = vpop.f32.mrb[30].mxu1  ;;  %1371 = vmatprep.subr.bf16.mxu0 %v1370_v43 }
 0x205   : > { %v925_v49 = vadd.f32 %v1321_v48, %v1637_v53  ;;  %v916_v50 = vpop.f32.mrb[31].mxu1  ;;  %1373 = vmatpush1.bf16.msra.mxu0 %v1372_v40  ;;  %v972_v54 = vmul.f32 %v922_v44, %v922_v44 }
 0x206   : > { %v917_v51 = vadd.f32 %v1637_v53, %v916_v50  ;;  %1375 = vmatprep.subr.bf16.mxu0 %v1374_v41  ;;  %v970_v57 = vmul.f32 %v914_v46, %v914_v46  ;;  %v1466_v53 = vmov 0.0  }
 0x207   : > { %v973_v55 = vmul.f32 %v925_v49, %v925_v49  ;;  %v1384_v56 = vpack.c.bf16 %v925_v49, %v922_v44  ;;  %254 = vst.msk [vmem:[%s243_s13] sm:$0x3] %vm252_vm3, %v1466_v53 }
 0x208   : > { %v971_v58 = vmul.f32 %v917_v51, %v917_v51  ;;  %v1380_v59 = vpack.c.bf16 %v917_v51, %v914_v46 }
 0x209   : > { %1377 = vmatpush1.bf16.msra.mxu0 %v1376_v37  ;;  %v1382_v60 = vpack.c.bf16 %v973_v55, %v972_v54 }
 0x20a   : > { %v1378_v61 = vpack.c.bf16 %v971_v58, %v970_v57 }
 0x20c   : > { %1379 = vmatprep.subr.bf16.mxu0 %v1378_v61 }
 0x20d   : > { %1381 = vmatpush1.bf16.msra.mxu0 %v1380_v59 }
 0x20e   : > { %1383 = vmatprep.subr.bf16.mxu0 %v1382_v60  ;;  %v974_v5 = vld [vmem:[%s243_s13] sm:$0x3] }
 0x211   : > { %1385 = vmatpush1.bf16.msra.mxu0 %v1384_v56 }
 0x214   : > { %1187 = vmatmul.mubr.msk.f32.vlgmr.msra.gmra.mrb[32].mxu0 %vm936_vm2, %v1465_v52 }
 0x2e7   : > { %v1041_v2 = vpop.f32.mrb[32].mxu0 }
 0x2e8   : > { %v1043_v3 = vpop.f32.mrb[33].mxu0 }
 0x2e9   : > { %v1048_v52 = vcombine.low %v1041_v2, %v1043_v3 }
 0x2eb   : > { %v1055_v4 = vrot.slane %v1048_v52, %v1054_v28 }
 0x2ed   : > { %v1062_v6 = vrot.slane %v1055_v4, %v1054_v28 }
 0x2ef   : > { %v1064_v7 = vadd.f32 %v1062_v6, %v974_v5 }
 0x2f1   : > { %1069 = vst.msk [vmem:[%s243_s13] sm:$0x3] %vm252_vm3, %v1064_v7 }
 0x2f2 PF: > { %s15_s20 = sadd.s32 1, %s1463_s20   ;;  %s1694_s18 = smov %s1459_s19 }
 0x2f3   : > { %p12_p6 = scmp.ge.s32.totalorder %s15_s20, 4   ;;  %s1695_s19 = smov %s1697_s21 }
 0x2f5   :  { %14 = sbr.rel (!%p12_p6) target bundleno = 2 (0x2), region = 74 }

// kernel: discriminator_pixelgan_forward.3
= control target key start
LH: loop header
LB: loop body
LE: loop exit
PB: predicated region body
PF: predicated region fallthrough
CT: control target
= control target key end

     0   :  { %s1587_s27 = smov 0   ;;  %s1857_s0 = inlined_call_operand.vmem [shape: bf16[512,64], index: 0, kind: input, shape index: {}]   ;;  %s1858_s1 = inlined_call_operand.vmem [shape: bf16[64,128], index: 1, kind: input, shape index: {}]   ;;  %s1859_s2 = inlined_call_operand.vmem [shape: f32[1,128], index: 2, kind: input, shape index: {}]   ;;  %s1860_s3 = inlined_call_operand.vmem [shape: bf16[128,128], index: 3, kind: input, shape index: {}]   ;;  %s1861_s4 = inlined_call_operand.vmem [shape: f32[1,128], index: 4, kind: input, shape index: {}]   ;;  %s1862_s5 = inlined_call_operand.vmem [shape: f32[1,128], index: 5, kind: input, shape index: {}]   ;;  %s1863_s6 = inlined_call_operand.vmem [shape: f32[1,128], index: 6, kind: input, shape index: {}]   ;;  %s1864_s7 = inlined_call_operand.vmem [shape: bf16[1,128], index: 7, kind: input, shape index: {}]   ;;  %s1865_s8 = inlined_call_operand.vmem [shape: bf16[1,512], index: 8, kind: output, shape index: {}]  }
   0x1 LB: > { %s1279_s28 = sadd.s32 4294967295, %s1539_s27   ;;  %p1283_p0 = scmp.ge.s32.totalorder %s1539_s27, 1  ;;  %s1539_s27 = sphi %s1587_s27, %s18_s27  }
   0x2   : > { %p263_p1 = scmp.lt.s32.totalorder %s1539_s27, 3 }
   0x4   : > { %p264_p2 = pnand %p1283_p0, %p263_p1 }
   0x5   : > { %v1497_v0 = vld [vmem:[%s1858_s1] sm:$0xff] (!%p264_p2)   ;;  %s1284_s9 = sshll.u32 (!%p264_p2), %s1279_s28, 5  ;;  %v1498_v1 = vld [vmem:[%s1858_s1 + $0x8] sm:$0xff] (!%p264_p2)   ;;  %v1499_v2 = vld [vmem:[%s1858_s1 + $0x10] sm:$0xff] (!%p264_p2)   ;;  %vm459_vm0 = vcmask (!%p264_p2), 523264   ;;  %s1286_s26 = sshll.u32 (!%p264_p2), %s1279_s28, 1 }
   0x6   : > { %267 = sbr.rel (%p264_p2) target bundleno = 823 (0x337), region = 52  ;;  %p297_p3 = scmp.lt.s32.totalorder (!%p264_p2), %s1284_s9, 63  ;;  %1400 = vmatprep.subr.bf16.mxu0 (!%p264_p2), %v1497_v0  ;;  %v1517_v3 = vld [vmem:[%s1860_s3] sm:$0xff] (!%p264_p2)   ;;  %v1518_v4 = vld [vmem:[%s1860_s3 + $0x8] sm:$0xff] (!%p264_p2)   ;;  %v1500_v5 = vld [vmem:[%s1858_s1 + $0x18] sm:$0xff] (!%p264_p2)   ;;  %vm1219_vm1 = vcmask (!%p264_p2), 1040384  }
   0x7   : > { %1401 = vmatpush3.bf16.msra.mxu0 (!%p264_p2), %v1497_v0  ;;  %1440 = vmatprep.subr.bf16.mxu1 (!%p264_p2), %v1517_v3  ;;  %v1519_v7 = vld [vmem:[%s1860_s3 + $0x10] sm:$0xff] (!%p264_p2)   ;;  %v1520_v12 = vld [vmem:[%s1860_s3 + $0x18] sm:$0xff] (!%p264_p2)   ;;  %v1521_v13 = vld [vmem:[%s1860_s3 + $0x20] sm:$0xff] (!%p264_p2)   ;;  %p303_p4 = scmp.lt.s32.totalorder (!%p264_p2), %s1286_s26, 3  ;;  %vm1220_vm2 = vsmask.f32 (!%p264_p2), 256 }
   0x8   : > { %1402 = vmatprep.subr.bf16.mxu0 (!%p264_p2), %v1498_v1  ;;  %1441 = vmatpush3.bf16.msra.mxu1 (!%p264_p2), %v1517_v3  ;;  %v1522_v25 = vld [vmem:[%s1860_s3 + $0x28] sm:$0xff] (!%p264_p2)   ;;  %v1523_v26 = vld [vmem:[%s1860_s3 + $0x30] sm:$0xff] (!%p264_p2)   ;;  %v1524_v27 = vld [vmem:[%s1860_s3 + $0x38] sm:$0xff] (!%p264_p2)   ;;  %vm1222_vm4 = vcmask (!%p264_p2), 1041409   ;;  %vm1223_vm5 = vsmask.f32 (!%p264_p2), 1280 }
   0x9   : > { %1442 = vmatprep.subr.bf16.mxu1 (!%p264_p2), %v1518_v4  ;;  %v1673_v28 = vld [vmem:[%s1859_s2] ss:$0 sm:$0xff] (!%p264_p2)  ;;  %vm1221_vm7 = vmand (!%p264_p2), %vm1219_vm1, %vm1220_vm2 }
   0xa   : > { %vm1224_vm8 = vmand (!%p264_p2), %vm1222_vm4, %vm1223_vm5 }
   0xb   : > { %1403 = vmatpush3.bf16.msra.mxu0 (!%p264_p2), %v1498_v1  ;;  %vm1225_vm9 = vmor (!%p264_p2), %vm1224_vm8, %vm1221_vm7 }
   0xc   : > { %1404 = vmatprep.subr.bf16.mxu0 (!%p264_p2), %v1499_v2  ;;  %1443 = vmatpush3.bf16.msra.mxu1 (!%p264_p2), %v1518_v4 }
   0xd   : > { %s1867_s9 = smov (!%p297_p3, %s1284_s9), 63  ;;  %1444 = vmatprep.subr.bf16.mxu1 %v1519_v7  ;;  %s1869_s26 = smov (!%p303_p4, %s1286_s26), 3 }
   0xe   : > { %s1285_s16 = sshll.u32 %s1867_s9, 2  ;;  %s305_s30 = scalar_lea.vmem %s1865_s8, %s1869_s26 }
   0xf   : > { %s1618_s23 = scalar_lea.vmem %s1857_s0, %s1285_s16  ;;  %1405 = vmatpush3.bf16.msra.mxu0 %v1499_v2 }
  0x10   : > { %v1501_v6 = vld [vmem:[%s1618_s23] sm:$0xff]   ;;  %1406 = vmatprep.subr.bf16.mxu0 %v1500_v5  ;;  %v1502_v8 = vld [vmem:[%s1618_s23 + $0x8] sm:$0xff]   ;;  %v1503_v9 = vld [vmem:[%s1618_s23 + $0x10] sm:$0xff]   ;;  %1445 = vmatpush3.bf16.msra.mxu1 %v1519_v7 }
  0x11   : > { %1408 = vmatprep.mubr.msk.bf16.mxu0 %vm459_vm0, %v1501_v6  ;;  %v1504_v10 = vld [vmem:[%s1618_s23 + $0x18] sm:$0xff]   ;;  %v1505_v11 = vld [vmem:[%s1618_s23 + $0x20] sm:$0xff]   ;;  %1446 = vmatprep.subr.bf16.mxu1 %v1520_v12  ;;  %v1506_v14 = vld [vmem:[%s1618_s23 + $0x28] sm:$0xff]  }
  0x12   : > { %v1507_v15 = vld [vmem:[%s1618_s23 + $0x30] sm:$0xff]   ;;  %v1508_v16 = vld [vmem:[%s1618_s23 + $0x38] sm:$0xff]   ;;  %v1509_v17 = vld [vmem:[%s1618_s23 + $0x40] sm:$0xff]  }
  0x13   : > { %1407 = vmatpush3.bf16.msra.mxu0 %v1500_v5  ;;  %v1510_v18 = vld [vmem:[%s1618_s23 + $0x48] sm:$0xff]   ;;  %v1511_v19 = vld [vmem:[%s1618_s23 + $0x50] sm:$0xff]   ;;  %v1512_v20 = vld [vmem:[%s1618_s23 + $0x58] sm:$0xff]  }
  0x14   : > { %1447 = vmatpush3.bf16.msra.mxu1 %v1520_v12  ;;  %v1513_v21 = vld [vmem:[%s1618_s23 + $0x60] sm:$0xff]   ;;  %v1514_v22 = vld [vmem:[%s1618_s23 + $0x68] sm:$0xff]   ;;  %v1515_v23 = vld [vmem:[%s1618_s23 + $0x70] sm:$0xff]  }
  0x15   : > { %1448 = vmatprep.subr.bf16.mxu1 %v1521_v13  ;;  %v1516_v24 = vld [vmem:[%s1618_s23 + $0x78] sm:$0xff]  }
  0x16   : > { %1409 = vmatmul.mubr.msk.bf16.vlgmr.msra.gmra.mrb[0].mxu0 %vm459_vm0, %v1502_v8 }
  0x17   : > { %1412 = vmatprep.mubr.msk.bf16.mxu0 %vm459_vm0, %v1503_v9 }
  0x18   : > { %1449 = vmatpush3.bf16.msra.mxu1 %v1521_v13 }
  0x19   : > { %1450 = vmatprep.subr.bf16.mxu1 %v1522_v25 }
  0x1c   : > { %1451 = vmatpush3.bf16.msra.mxu1 %v1522_v25 }
  0x1d   : > { %1452 = vmatprep.subr.bf16.mxu1 %v1523_v26 }
  0x1e   : > { %1413 = vmatmul.mubr.msk.bf16.gmra.mrb[4].mxu0 %vm459_vm0, %v1504_v10 }
  0x1f   : > { %1416 = vmatprep.mubr.msk.bf16.mxu0 %vm459_vm0, %v1505_v11 }
  0x20   : > { %1453 = vmatpush3.bf16.msra.mxu1 %v1523_v26 }
  0x21   : > { %1454 = vmatprep.subr.bf16.mxu1 %v1524_v27 }
  0x24   : > { %1455 = vmatpush3.bf16.msra.mxu1 %v1524_v27 }
  0x26   : > { %1417 = vmatmul.mubr.msk.bf16.gmra.mrb[8].mxu0 %vm459_vm0, %v1506_v14 }
  0x27   : > { %1420 = vmatprep.mubr.msk.bf16.mxu0 %vm459_vm0, %v1507_v15 }
  0x2e   : > { %1421 = vmatmul.mubr.msk.bf16.gmra.mrb[12].mxu0 %vm459_vm0, %v1508_v16 }
  0x2f   : > { %1424 = vmatprep.mubr.msk.bf16.mxu0 %vm459_vm0, %v1509_v17 }
  0x36   : > { %1425 = vmatmul.mubr.msk.bf16.gmra.mrb[16].mxu0 %vm459_vm0, %v1510_v18 }
  0x37   : > { %1428 = vmatprep.mubr.msk.bf16.mxu0 %vm459_vm0, %v1511_v19 }
  0x3e   : > { %1429 = vmatmul.mubr.msk.bf16.gmra.mrb[20].mxu0 %vm459_vm0, %v1512_v20 }
  0x3f   : > { %1432 = vmatprep.mubr.msk.bf16.mxu0 %vm459_vm0, %v1513_v21 }
  0x46   : > { %1433 = vmatmul.mubr.msk.bf16.gmra.mrb[24].mxu0 %vm459_vm0, %v1514_v22 }
  0x47   : > { %1436 = vmatprep.mubr.msk.bf16.mxu0 %vm459_vm0, %v1515_v23 }
  0x4e   : > { %1437 = vmatmul.mubr.msk.bf16.gmra.mrb[28].mxu0 %vm459_vm0, %v1516_v24 }
  0xe9   : > { %v1410_v29 = vpop.f32.mrb[0].mxu0 }
  0xea   : > { %v551_v30 = vadd.f32 %v1410_v29, %v1673_v28  ;;  %v542_v31 = vpop.f32.mrb[1].mxu0 }
  0xeb   : > { %v543_v32 = vadd.f32 %v1673_v28, %v542_v31  ;;  %v1411_v33 = vpop.f32.mrb[2].mxu0 }
  0xec   : > { %v671_v34 = vmul.f32 0.2, %v551_v30  ;;  %v554_v35 = vadd.f32 %v1411_v33, %v1673_v28  ;;  %v545_v36 = vpop.f32.mrb[3].mxu0 }
  0xed   : > { %v669_v37 = vmul.f32 0.2, %v543_v32  ;;  %v546_v38 = vadd.f32 %v1673_v28, %v545_v36 }
  0xee   : > { %v672_v39 = vmul.f32 0.2, %v554_v35  ;;  %v703_v41 = vmax.f32 %v551_v30, %v671_v34 }
  0xef   : > { %v670_v40 = vmul.f32 0.2, %v546_v38  ;;  %v701_v44 = vmax.f32 %v543_v32, %v669_v37 }
  0xf0   : > { %v704_v42 = vmax.f32 %v554_v35, %v672_v39 }
  0xf1   : > { %v1414_v43 = vpop.f32.mrb[4].mxu0  ;;  %v702_v45 = vmax.f32 %v546_v38, %v670_v40 }
  0xf2   : > { %v567_v46 = vadd.f32 %v1414_v43, %v1673_v28  ;;  %v558_v47 = vpop.f32.mrb[5].mxu0  ;;  %v734_v48 = vpack.c.bf16 %v704_v42, %v703_v41 }
  0xf3   : > { %v559_v49 = vadd.f32 %v1673_v28, %v558_v47  ;;  %v1415_v50 = vpop.f32.mrb[6].mxu0  ;;  %v733_v51 = vpack.c.bf16 %v702_v45, %v701_v44 }
  0xf4   : > { %v675_v52 = vmul.f32 0.2, %v567_v46  ;;  %v570_v53 = vadd.f32 %v1415_v50, %v1673_v28  ;;  %v561_v54 = vpop.f32.mrb[7].mxu0 }
  0xf5   : > { %v673_v55 = vmul.f32 0.2, %v559_v49  ;;  %v562_v56 = vadd.f32 %v1673_v28, %v561_v54  ;;  %1456 = vmatprep.mubr.bf16.mxu1 %v733_v51 }
  0xf6   : > { %v676_v57 = vmul.f32 0.2, %v570_v53  ;;  %1457 = vmatmul.mubr.bf16.vlgmr.msra.gmra.mrb[0].mxu1 %v734_v48  ;;  %v707_v59 = vmax.f32 %v567_v46, %v675_v52 }
  0xf7   : > { %v674_v58 = vmul.f32 0.2, %v562_v56  ;;  %v705_v61 = vmax.f32 %v559_v49, %v673_v55 }
  0xf8   : > { %v708_v60 = vmax.f32 %v570_v53, %v676_v57 }
  0xf9   : > { %v706_v62 = vmax.f32 %v562_v56, %v674_v58  ;;  %v1418_v63 = vpop.f32.mrb[8].mxu0 }
  0xfa   : > { %v583_v0 = vadd.f32 %v1418_v63, %v1673_v28  ;;  %v574_v1 = vpop.f32.mrb[9].mxu0  ;;  %v736_v2 = vpack.c.bf16 %v708_v60, %v707_v59 }
  0xfb   : > { %v575_v3 = vadd.f32 %v1673_v28, %v574_v1  ;;  %v1419_v4 = vpop.f32.mrb[10].mxu0  ;;  %v735_v5 = vpack.c.bf16 %v706_v62, %v705_v61 }
  0xfc   : > { %v679_v6 = vmul.f32 0.2, %v583_v0  ;;  %v586_v7 = vadd.f32 %v1419_v4, %v1673_v28  ;;  %v577_v8 = vpop.f32.mrb[11].mxu0 }
  0xfd   : > { %v677_v9 = vmul.f32 0.2, %v575_v3  ;;  %v578_v10 = vadd.f32 %v1673_v28, %v577_v8  ;;  %1460 = vmatprep.mubr.bf16.mxu1 %v735_v5 }
  0xfe   : > { %v680_v11 = vmul.f32 0.2, %v586_v7  ;;  %1461 = vmatmul.mubr.bf16.gmra.mrb[4].mxu1 %v736_v2  ;;  %v711_v13 = vmax.f32 %v583_v0, %v679_v6 }
  0xff   : > { %v678_v12 = vmul.f32 0.2, %v578_v10  ;;  %v709_v15 = vmax.f32 %v575_v3, %v677_v9 }
 0x100   : > { %v712_v14 = vmax.f32 %v586_v7, %v680_v11 }
 0x101   : > { %v710_v16 = vmax.f32 %v578_v10, %v678_v12  ;;  %v1422_v17 = vpop.f32.mrb[12].mxu0 }
 0x102   : > { %v599_v18 = vadd.f32 %v1422_v17, %v1673_v28  ;;  %v590_v19 = vpop.f32.mrb[13].mxu0  ;;  %v738_v20 = vpack.c.bf16 %v712_v14, %v711_v13 }
 0x103   : > { %v591_v21 = vadd.f32 %v1673_v28, %v590_v19  ;;  %v1423_v22 = vpop.f32.mrb[14].mxu0  ;;  %v737_v23 = vpack.c.bf16 %v710_v16, %v709_v15 }
 0x104   : > { %v683_v24 = vmul.f32 0.2, %v599_v18  ;;  %v602_v25 = vadd.f32 %v1423_v22, %v1673_v28  ;;  %v593_v26 = vpop.f32.mrb[15].mxu0 }
 0x105   : > { %v681_v27 = vmul.f32 0.2, %v591_v21  ;;  %v594_v29 = vadd.f32 %v1673_v28, %v593_v26  ;;  %1464 = vmatprep.mubr.bf16.mxu1 %v737_v23 }
 0x106   : > { %v684_v30 = vmul.f32 0.2, %v602_v25  ;;  %1465 = vmatmul.mubr.bf16.gmra.mrb[8].mxu1 %v738_v20  ;;  %v715_v32 = vmax.f32 %v599_v18, %v683_v24 }
 0x107   : > { %v682_v31 = vmul.f32 0.2, %v594_v29  ;;  %v713_v34 = vmax.f32 %v591_v21, %v681_v27 }
 0x108   : > { %v716_v33 = vmax.f32 %v602_v25, %v684_v30 }
 0x109   : > { %v714_v35 = vmax.f32 %v594_v29, %v682_v31  ;;  %v1426_v36 = vpop.f32.mrb[16].mxu0 }
 0x10a   : > { %v615_v37 = vadd.f32 %v1426_v36, %v1673_v28  ;;  %v606_v38 = vpop.f32.mrb[17].mxu0  ;;  %v740_v39 = vpack.c.bf16 %v716_v33, %v715_v32 }
 0x10b   : > { %v607_v40 = vadd.f32 %v1673_v28, %v606_v38  ;;  %v1427_v41 = vpop.f32.mrb[18].mxu0  ;;  %v739_v42 = vpack.c.bf16 %v714_v35, %v713_v34 }
 0x10c   : > { %v687_v43 = vmul.f32 0.2, %v615_v37  ;;  %v618_v44 = vadd.f32 %v1427_v41, %v1673_v28  ;;  %v609_v45 = vpop.f32.mrb[19].mxu0 }
 0x10d   : > { %v685_v46 = vmul.f32 0.2, %v607_v40  ;;  %v610_v47 = vadd.f32 %v1673_v28, %v609_v45  ;;  %1468 = vmatprep.mubr.bf16.mxu1 %v739_v42 }
 0x10e   : > { %v688_v48 = vmul.f32 0.2, %v618_v44  ;;  %1469 = vmatmul.mubr.bf16.gmra.mrb[12].mxu1 %v740_v39  ;;  %v719_v50 = vmax.f32 %v615_v37, %v687_v43 }
 0x10f   : > { %v686_v49 = vmul.f32 0.2, %v610_v47  ;;  %v717_v52 = vmax.f32 %v607_v40, %v685_v46 }
 0x110   : > { %v720_v51 = vmax.f32 %v618_v44, %v688_v48 }
 0x111   : > { %v718_v53 = vmax.f32 %v610_v47, %v686_v49  ;;  %v1430_v54 = vpop.f32.mrb[20].mxu0  ;;  %v1710_v47 = vld [vmem:[%s1864_s7] sm:$0x1] }
 0x112   : > { %v631_v55 = vadd.f32 %v1430_v54, %v1673_v28  ;;  %v622_v56 = vpop.f32.mrb[21].mxu0  ;;  %v742_v57 = vpack.c.bf16 %v720_v51, %v719_v50  ;;  %1398 = vmatprep.mubr.bf16.mxu0 %v1710_v47  ;;  %v1721_v49 = vld [vmem:[%s1862_s5] ss:$0 sm:$0xff] }
 0x113   : > { %v623_v58 = vadd.f32 %v1673_v28, %v622_v56  ;;  %v1431_v59 = vpop.f32.mrb[22].mxu0  ;;  %v741_v60 = vpack.c.bf16 %v718_v53, %v717_v52  ;;  %v1727_v52 = vld [vmem:[%s1863_s6] ss:$0 sm:$0xff] }
 0x114   : > { %v691_v61 = vmul.f32 0.2, %v631_v55  ;;  %v634_v62 = vadd.f32 %v1431_v59, %v1673_v28  ;;  %v625_v63 = vpop.f32.mrb[23].mxu0 }
 0x115   : > { %v689_v0 = vmul.f32 0.2, %v623_v58  ;;  %v626_v1 = vadd.f32 %v1673_v28, %v625_v63  ;;  %1472 = vmatprep.mubr.bf16.mxu1 %v741_v60 }
 0x116   : > { %v723_v2 = vmax.f32 %v631_v55, %v691_v61  ;;  %v692_v3 = vmul.f32 0.2, %v634_v62  ;;  %1473 = vmatmul.mubr.bf16.gmra.mrb[16].mxu1 %v742_v57 }
 0x117   : > { %v721_v4 = vmax.f32 %v623_v58, %v689_v0  ;;  %v690_v5 = vmul.f32 0.2, %v626_v1 }
 0x118   : > { %v724_v6 = vmax.f32 %v634_v62, %v692_v3 }
 0x119   : > { %v722_v7 = vmax.f32 %v626_v1, %v690_v5  ;;  %v1434_v8 = vpop.f32.mrb[24].mxu0 }
 0x11a   : > { %v647_v9 = vadd.f32 %v1434_v8, %v1673_v28  ;;  %v744_v10 = vpack.c.bf16 %v724_v6, %v723_v2  ;;  %v638_v11 = vpop.f32.mrb[25].mxu0 }
 0x11b   : > { %v743_v12 = vpack.c.bf16 %v722_v7, %v721_v4  ;;  %v639_v13 = vadd.f32 %v1673_v28, %v638_v11  ;;  %v1435_v14 = vpop.f32.mrb[26].mxu0 }
 0x11c   : > { %v695_v15 = vmul.f32 0.2, %v647_v9  ;;  %v650_v16 = vadd.f32 %v1435_v14, %v1673_v28  ;;  %v641_v17 = vpop.f32.mrb[27].mxu0 }
 0x11d   : > { %1476 = vmatprep.mubr.bf16.mxu1 %v743_v12  ;;  %v693_v18 = vmul.f32 0.2, %v639_v13  ;;  %v642_v19 = vadd.f32 %v1673_v28, %v641_v17 }
 0x11e   : > { %v727_v20 = vmax.f32 %v647_v9, %v695_v15  ;;  %1477 = vmatmul.mubr.bf16.gmra.mrb[20].mxu1 %v744_v10  ;;  %v696_v21 = vmul.f32 0.2, %v650_v16 }
 0x11f   : > { %v725_v22 = vmax.f32 %v639_v13, %v693_v18  ;;  %v694_v23 = vmul.f32 0.2, %v642_v19 }
 0x120   : > { %v728_v24 = vmax.f32 %v650_v16, %v696_v21 }
 0x121   : > { %v726_v25 = vmax.f32 %v642_v19, %v694_v23  ;;  %v1438_v26 = vpop.f32.mrb[28].mxu0 }
 0x122   : > { %v746_v27 = vpack.c.bf16 %v728_v24, %v727_v20  ;;  %v663_v29 = vadd.f32 %v1438_v26, %v1673_v28  ;;  %v654_v30 = vpop.f32.mrb[29].mxu0 }
 0x123   : > { %v745_v31 = vpack.c.bf16 %v726_v25, %v725_v22  ;;  %v655_v32 = vadd.f32 %v1673_v28, %v654_v30  ;;  %v1439_v33 = vpop.f32.mrb[30].mxu0 }
 0x124   : > { %v699_v34 = vmul.f32 0.2, %v663_v29  ;;  %v666_v35 = vadd.f32 %v1439_v33, %v1673_v28  ;;  %v657_v36 = vpop.f32.mrb[31].mxu0 }
 0x125   : > { %1480 = vmatprep.mubr.bf16.mxu1 %v745_v31  ;;  %v697_v37 = vmul.f32 0.2, %v655_v32  ;;  %v658_v38 = vadd.f32 %v1673_v28, %v657_v36  ;;  %v1716_v28 = vld [vmem:[%s1861_s4] ss:$0 sm:$0xff] }
 0x126   : > { %1481 = vmatmul.mubr.bf16.gmra.mrb[24].mxu1 %v746_v27  ;;  %v731_v39 = vmax.f32 %v663_v29, %v699_v34  ;;  %v700_v40 = vmul.f32 0.2, %v666_v35 }
 0x127   : > { %v729_v41 = vmax.f32 %v655_v32, %v697_v37  ;;  %v698_v42 = vmul.f32 0.2, %v658_v38 }
 0x128   : > { %v732_v43 = vmax.f32 %v666_v35, %v700_v40 }
 0x129   : > { %v730_v44 = vmax.f32 %v658_v38, %v698_v42 }
 0x12a   : > { %v748_v45 = vpack.c.bf16 %v732_v43, %v731_v39 }
 0x12b   : > { %v747_v46 = vpack.c.bf16 %v730_v44, %v729_v41 }
 0x12d   : > { %1484 = vmatprep.mubr.bf16.mxu1 %v747_v46 }
 0x12e   : > { %1485 = vmatmul.mubr.bf16.gmra.mrb[28].mxu1 %v748_v45 }
 0x1c9   : > { %v1458_v48 = vpop.f32.mrb[0].mxu1 }
 0x1ca   : > { %v863_v50 = vadd.f32 %v1458_v48, %v1716_v28  ;;  %v854_v51 = vpop.f32.mrb[1].mxu1 }
 0x1cb   : > { %v855_v53 = vadd.f32 %v1716_v28, %v854_v51  ;;  %v1459_v54 = vpop.f32.mrb[2].mxu1 }
 0x1cc   : > { %v990_v55 = vmul.f32 %v1721_v49, %v863_v50  ;;  %v866_v56 = vadd.f32 %v1459_v54, %v1716_v28  ;;  %v857_v57 = vpop.f32.mrb[3].mxu1 }
 0x1cd   : > { %v988_v58 = vmul.f32 %v1721_v49, %v855_v53  ;;  %v858_v59 = vadd.f32 %v1716_v28, %v857_v57 }
 0x1ce   : > { %v1029_v60 = vadd.f32 %v1727_v52, %v990_v55  ;;  %v991_v61 = vmul.f32 %v1721_v49, %v866_v56 }
 0x1cf   : > { %v1027_v62 = vadd.f32 %v1727_v52, %v988_v58  ;;  %v989_v63 = vmul.f32 %v1721_v49, %v858_v59 }
 0x1d0   : > { %v1061_v0 = vmul.f32 0.2, %v1029_v60  ;;  %v1030_v1 = vadd.f32 %v1727_v52, %v991_v61 }
 0x1d1   : > { %v1059_v2 = vmul.f32 0.2, %v1027_v62  ;;  %v1028_v3 = vadd.f32 %v1727_v52, %v989_v63  ;;  %v1462_v4 = vpop.f32.mrb[4].mxu1 }
 0x1d2   : > { %v1062_v5 = vmul.f32 0.2, %v1030_v1  ;;  %v879_v6 = vadd.f32 %v1462_v4, %v1716_v28  ;;  %v870_v7 = vpop.f32.mrb[5].mxu1  ;;  %v1093_v11 = vmax.f32 %v1029_v60, %v1061_v0 }
 0x1d3   : > { %v1060_v8 = vmul.f32 0.2, %v1028_v3  ;;  %v871_v9 = vadd.f32 %v1716_v28, %v870_v7  ;;  %v1463_v10 = vpop.f32.mrb[6].mxu1  ;;  %v1091_v16 = vmax.f32 %v1027_v62, %v1059_v2 }
 0x1d4   : > { %v1094_v12 = vmax.f32 %v1030_v1, %v1062_v5  ;;  %v994_v13 = vmul.f32 %v1721_v49, %v879_v6  ;;  %v882_v14 = vadd.f32 %v1463_v10, %v1716_v28  ;;  %v873_v15 = vpop.f32.mrb[7].mxu1 }
 0x1d5   : > { %v1092_v17 = vmax.f32 %v1028_v3, %v1060_v8  ;;  %v992_v18 = vmul.f32 %v1721_v49, %v871_v9  ;;  %v874_v19 = vadd.f32 %v1716_v28, %v873_v15 }
 0x1d6   : > { %v1033_v20 = vadd.f32 %v1727_v52, %v994_v13  ;;  %v995_v21 = vmul.f32 %v1721_v49, %v882_v14  ;;  %v1748_v22 = vpack.c.bf16 %v1094_v12, %v1093_v11 }
 0x1d7   : > { %v1031_v23 = vadd.f32 %v1727_v52, %v992_v18  ;;  %v993_v24 = vmul.f32 %v1721_v49, %v874_v19  ;;  %v1752_v25 = vpack.c.bf16 %v1092_v17, %v1091_v16 }
 0x1d8   : > { %v1065_v26 = vmul.f32 0.2, %v1033_v20  ;;  %v1034_v27 = vadd.f32 %v1727_v52, %v995_v21 }
 0x1d9   : > { %v1063_v29 = vmul.f32 0.2, %v1031_v23  ;;  %v1032_v30 = vadd.f32 %v1727_v52, %v993_v24  ;;  %v1466_v31 = vpop.f32.mrb[8].mxu1 }
 0x1da   : > { %v1066_v32 = vmul.f32 0.2, %v1034_v27  ;;  %v895_v33 = vadd.f32 %v1466_v31, %v1716_v28  ;;  %v886_v34 = vpop.f32.mrb[9].mxu1  ;;  %v1097_v38 = vmax.f32 %v1033_v20, %v1065_v26 }
 0x1db   : > { %v1064_v35 = vmul.f32 0.2, %v1032_v30  ;;  %v887_v36 = vadd.f32 %v1716_v28, %v886_v34  ;;  %v1467_v37 = vpop.f32.mrb[10].mxu1  ;;  %v1095_v43 = vmax.f32 %v1031_v23, %v1063_v29 }
 0x1dc   : > { %v1098_v39 = vmax.f32 %v1034_v27, %v1066_v32  ;;  %v998_v40 = vmul.f32 %v1721_v49, %v895_v33  ;;  %v898_v41 = vadd.f32 %v1467_v37, %v1716_v28  ;;  %v889_v42 = vpop.f32.mrb[11].mxu1 }
 0x1dd   : > { %v1096_v44 = vmax.f32 %v1032_v30, %v1064_v35  ;;  %v996_v45 = vmul.f32 %v1721_v49, %v887_v36  ;;  %v890_v46 = vadd.f32 %v1716_v28, %v889_v42 }
 0x1de   : > { %v1037_v48 = vadd.f32 %v1727_v52, %v998_v40  ;;  %v999_v50 = vmul.f32 %v1721_v49, %v898_v41  ;;  %v1764_v51 = vpack.c.bf16 %v1098_v39, %v1097_v38 }
 0x1df   : > { %v1035_v53 = vadd.f32 %v1727_v52, %v996_v45  ;;  %v997_v54 = vmul.f32 %v1721_v49, %v890_v46  ;;  %v1768_v55 = vpack.c.bf16 %v1096_v44, %v1095_v43 }
 0x1e0   : > { %v1069_v56 = vmul.f32 0.2, %v1037_v48  ;;  %v1038_v57 = vadd.f32 %v1727_v52, %v999_v50 }
 0x1e1   : > { %v1067_v58 = vmul.f32 0.2, %v1035_v53  ;;  %v1036_v59 = vadd.f32 %v1727_v52, %v997_v54  ;;  %v1470_v60 = vpop.f32.mrb[12].mxu1 }
 0x1e2   : > { %v1070_v61 = vmul.f32 0.2, %v1038_v57  ;;  %v911_v62 = vadd.f32 %v1470_v60, %v1716_v28  ;;  %v902_v63 = vpop.f32.mrb[13].mxu1  ;;  %v1101_v3 = vmax.f32 %v1037_v48, %v1069_v56 }
 0x1e3   : > { %v1068_v0 = vmul.f32 0.2, %v1036_v59  ;;  %v903_v1 = vadd.f32 %v1716_v28, %v902_v63  ;;  %v1471_v2 = vpop.f32.mrb[14].mxu1  ;;  %v1099_v8 = vmax.f32 %v1035_v53, %v1067_v58 }
 0x1e4   : > { %v1102_v4 = vmax.f32 %v1038_v57, %v1070_v61  ;;  %v1002_v5 = vmul.f32 %v1721_v49, %v911_v62  ;;  %v914_v6 = vadd.f32 %v1471_v2, %v1716_v28  ;;  %v905_v7 = vpop.f32.mrb[15].mxu1 }
 0x1e5   : > { %v1100_v9 = vmax.f32 %v1036_v59, %v1068_v0  ;;  %v1000_v10 = vmul.f32 %v1721_v49, %v903_v1  ;;  %v906_v11 = vadd.f32 %v1716_v28, %v905_v7 }
 0x1e6   : > { %v1041_v12 = vadd.f32 %v1727_v52, %v1002_v5  ;;  %v1003_v13 = vmul.f32 %v1721_v49, %v914_v6  ;;  %v1780_v14 = vpack.c.bf16 %v1102_v4, %v1101_v3 }
 0x1e7   : > { %v1039_v15 = vadd.f32 %v1727_v52, %v1000_v10  ;;  %v1001_v16 = vmul.f32 %v1721_v49, %v906_v11  ;;  %v1784_v17 = vpack.c.bf16 %v1100_v9, %v1099_v8 }
 0x1e8   : > { %v1073_v18 = vmul.f32 0.2, %v1041_v12  ;;  %v1042_v19 = vadd.f32 %v1727_v52, %v1003_v13 }
 0x1e9   : > { %v1071_v20 = vmul.f32 0.2, %v1039_v15  ;;  %v1040_v21 = vadd.f32 %v1727_v52, %v1001_v16  ;;  %v1474_v23 = vpop.f32.mrb[16].mxu1 }
 0x1ea   : > { %v1074_v24 = vmul.f32 0.2, %v1042_v19  ;;  %v927_v26 = vadd.f32 %v1474_v23, %v1716_v28  ;;  %v918_v27 = vpop.f32.mrb[17].mxu1  ;;  %v1105_v32 = vmax.f32 %v1041_v12, %v1073_v18 }
 0x1eb   : > { %v1072_v29 = vmul.f32 0.2, %v1040_v21  ;;  %v919_v30 = vadd.f32 %v1716_v28, %v918_v27  ;;  %v1475_v31 = vpop.f32.mrb[18].mxu1  ;;  %v1103_v37 = vmax.f32 %v1039_v15, %v1071_v20 }
 0x1ec   : > { %v1106_v33 = vmax.f32 %v1042_v19, %v1074_v24  ;;  %v1006_v34 = vmul.f32 %v1721_v49, %v927_v26  ;;  %v930_v35 = vadd.f32 %v1475_v31, %v1716_v28  ;;  %v921_v36 = vpop.f32.mrb[19].mxu1 }
 0x1ed   : > { %v1104_v38 = vmax.f32 %v1040_v21, %v1072_v29  ;;  %v1004_v39 = vmul.f32 %v1721_v49, %v919_v30  ;;  %v922_v40 = vadd.f32 %v1716_v28, %v921_v36 }
 0x1ee   : > { %v1045_v41 = vadd.f32 %v1727_v52, %v1006_v34  ;;  %v1007_v42 = vmul.f32 %v1721_v49, %v930_v35  ;;  %v1796_v43 = vpack.c.bf16 %v1106_v33, %v1105_v32 }
 0x1ef   : > { %v1043_v44 = vadd.f32 %v1727_v52, %v1004_v39  ;;  %v1005_v45 = vmul.f32 %v1721_v49, %v922_v40  ;;  %v1800_v46 = vpack.c.bf16 %v1104_v38, %v1103_v37 }
 0x1f0   : > { %v1077_v48 = vmul.f32 0.2, %v1045_v41  ;;  %v1046_v50 = vadd.f32 %v1727_v52, %v1007_v42 }
 0x1f1   : > { %v1075_v53 = vmul.f32 0.2, %v1043_v44  ;;  %v1044_v54 = vadd.f32 %v1727_v52, %v1005_v45  ;;  %v1478_v56 = vpop.f32.mrb[20].mxu1 }
 0x1f2   : > { %v1078_v57 = vmul.f32 0.2, %v1046_v50  ;;  %v943_v58 = vadd.f32 %v1478_v56, %v1716_v28  ;;  %v934_v59 = vpop.f32.mrb[21].mxu1  ;;  %v1109_v2 = vmax.f32 %v1045_v41, %v1077_v48 }
 0x1f3   : > { %v1076_v60 = vmul.f32 0.2, %v1044_v54  ;;  %v935_v61 = vadd.f32 %v1716_v28, %v934_v59  ;;  %v1479_v62 = vpop.f32.mrb[22].mxu1  ;;  %v1107_v6 = vmax.f32 %v1043_v44, %v1075_v53 }
 0x1f4   : > { %v1010_v63 = vmul.f32 %v1721_v49, %v943_v58  ;;  %v946_v0 = vadd.f32 %v1479_v62, %v1716_v28  ;;  %v937_v1 = vpop.f32.mrb[23].mxu1  ;;  %v1110_v3 = vmax.f32 %v1046_v50, %v1078_v57 }
 0x1f5   : > { %v1008_v4 = vmul.f32 %v1721_v49, %v935_v61  ;;  %v938_v5 = vadd.f32 %v1716_v28, %v937_v1  ;;  %v1108_v7 = vmax.f32 %v1044_v54, %v1076_v60 }
 0x1f6   : > { %v1049_v8 = vadd.f32 %v1727_v52, %v1010_v63  ;;  %v1011_v9 = vmul.f32 %v1721_v49, %v946_v0  ;;  %v1133_v10 = vpack.c.bf16 %v1110_v3, %v1109_v2 }
 0x1f7   : > { %v1047_v11 = vadd.f32 %v1727_v52, %v1008_v4  ;;  %v1009_v12 = vmul.f32 %v1721_v49, %v938_v5  ;;  %v1132_v13 = vpack.c.bf16 %v1108_v7, %v1107_v6 }
 0x1f8   : > { %v1081_v15 = vmul.f32 0.2, %v1049_v8  ;;  %v1050_v16 = vadd.f32 %v1727_v52, %v1011_v9 }
 0x1f9   : > { %v1079_v18 = vmul.f32 0.2, %v1047_v11  ;;  %v1048_v19 = vadd.f32 %v1727_v52, %v1009_v12  ;;  %1382 = vmatprep.subr.bf16.mxu0 %v1132_v13  ;;  %v1482_v20 = vpop.f32.mrb[24].mxu1 }
 0x1fa   : > { %v1082_v21 = vmul.f32 0.2, %v1050_v16  ;;  %1383 = vmatpush3.bf16.xpose.msra.mxu0 %v1752_v25  ;;  %v959_v23 = vadd.f32 %v1482_v20, %v1716_v28  ;;  %v950_v24 = vpop.f32.mrb[25].mxu1  ;;  %v1113_v33 = vmax.f32 %v1049_v8, %v1081_v15 }
 0x1fb   : > { %v1080_v26 = vmul.f32 0.2, %v1048_v19  ;;  %1384 = vmatprep.subr.bf16.mxu0 %v1133_v10  ;;  %v951_v27 = vadd.f32 %v1716_v28, %v950_v24  ;;  %v1483_v29 = vpop.f32.mrb[26].mxu1  ;;  %v1111_v25 = vmax.f32 %v1047_v11, %v1079_v18 }
 0x1fc   : > { %v1014_v30 = vmul.f32 %v1721_v49, %v959_v23  ;;  %v962_v31 = vadd.f32 %v1483_v29, %v1716_v28  ;;  %v953_v32 = vpop.f32.mrb[27].mxu1  ;;  %v1114_v34 = vmax.f32 %v1050_v16, %v1082_v21 }
 0x1fd   : > { %v1012_v35 = vmul.f32 %v1721_v49, %v951_v27  ;;  %v954_v36 = vadd.f32 %v1716_v28, %v953_v32  ;;  %v1112_v37 = vmax.f32 %v1048_v19, %v1080_v26 }
 0x1fe   : > { %v1053_v38 = vadd.f32 %v1727_v52, %v1014_v30  ;;  %v1015_v39 = vmul.f32 %v1721_v49, %v962_v31  ;;  %v1135_v40 = vpack.c.bf16 %v1114_v34, %v1113_v33 }
 0x1ff   : > { %v1051_v41 = vadd.f32 %v1727_v52, %v1012_v35  ;;  %v1013_v42 = vmul.f32 %v1721_v49, %v954_v36  ;;  %v1134_v44 = vpack.c.bf16 %v1112_v37, %v1111_v25  ;;  %v1207_v35 = vlaneseq }
 0x200   : > { %v1085_v45 = vmul.f32 0.2, %v1053_v38  ;;  %v1054_v48 = vadd.f32 %v1727_v52, %v1015_v39 }
 0x201   : > { %v1083_v50 = vmul.f32 0.2, %v1051_v41  ;;  %v1052_v53 = vadd.f32 %v1727_v52, %v1013_v42  ;;  %v1486_v54 = vpop.f32.mrb[28].mxu1  ;;  %v1208_v25 = vshrl.u32 %v1207_v35, 7 }
 0x202   : > { %v1086_v56 = vmul.f32 0.2, %v1054_v48  ;;  %1385 = vmatpush3.bf16.xpose.msra.mxu0 %v1748_v22  ;;  %v975_v57 = vadd.f32 %v1486_v54, %v1716_v28  ;;  %v966_v58 = vpop.f32.mrb[29].mxu1  ;;  %v1117_v59 = vmax.f32 %v1053_v38, %v1085_v45 }
 0x203   : > { %v1084_v60 = vmul.f32 0.2, %v1052_v53  ;;  %1386 = vmatprep.subr.bf16.mxu0 %v1134_v44  ;;  %v967_v61 = vadd.f32 %v1716_v28, %v966_v58  ;;  %v1487_v62 = vpop.f32.mrb[30].mxu1  ;;  %v1115_v63 = vmax.f32 %v1051_v41, %v1083_v50  ;;  %v1226_v50 = vld [vmem:[%s305_s30] sm:$0x3] }
 0x204   : > { %v1018_v0 = vmul.f32 %v1721_v49, %v975_v57  ;;  %v978_v1 = vadd.f32 %v1487_v62, %v1716_v28  ;;  %v969_v2 = vpop.f32.mrb[31].mxu1  ;;  %v1118_v3 = vmax.f32 %v1054_v48, %v1086_v56 }
 0x205   : > { %v1016_v4 = vmul.f32 %v1721_v49, %v967_v61  ;;  %v970_v22 = vadd.f32 %v1716_v28, %v969_v2  ;;  %v1116_v5 = vmax.f32 %v1052_v53, %v1084_v60 }
 0x206   : > { %v1057_v6 = vadd.f32 %v1727_v52, %v1018_v0  ;;  %v1019_v7 = vmul.f32 %v1721_v49, %v978_v1  ;;  %v1137_v8 = vpack.c.bf16 %v1118_v3, %v1117_v59 }
 0x207   : > { %v1055_v9 = vadd.f32 %v1727_v52, %v1016_v4  ;;  %v1017_v10 = vmul.f32 %v1721_v49, %v970_v22  ;;  %v1136_v11 = vpack.c.bf16 %v1116_v5, %v1115_v63 }
 0x208   : > { %v1089_v12 = vmul.f32 0.2, %v1057_v6  ;;  %v1058_v13 = vadd.f32 %v1727_v52, %v1019_v7 }
 0x209   : > { %v1087_v15 = vmul.f32 0.2, %v1055_v9  ;;  %v1056_v16 = vadd.f32 %v1727_v52, %v1017_v10 }
 0x20a   : > { %1387 = vmatpush3.bf16.xpose.msra.mxu0 %v1768_v55  ;;  %v1090_v28 = vmul.f32 0.2, %v1058_v13  ;;  %v1121_v18 = vmax.f32 %v1057_v6, %v1089_v12 }
 0x20b   : > { %1388 = vmatprep.subr.bf16.mxu0 %v1135_v40  ;;  %v1088_v19 = vmul.f32 0.2, %v1056_v16  ;;  %v1119_v20 = vmax.f32 %v1055_v9, %v1087_v15 }
 0x20c   : > { %v1122_v21 = vmax.f32 %v1058_v13, %v1090_v28 }
 0x20d   : > { %v1120_v23 = vmax.f32 %v1056_v16, %v1088_v19 }
 0x20e   : > { %v1139_v24 = vpack.c.bf16 %v1122_v21, %v1121_v18 }
 0x20f   : > { %v1138_v26 = vpack.c.bf16 %v1120_v23, %v1119_v20 }
 0x212   : > { %1389 = vmatpush3.bf16.xpose.msra.mxu0 %v1764_v51 }
 0x213   : > { %1390 = vmatprep.subr.bf16.mxu0 %v1136_v11 }
 0x21a   : > { %1391 = vmatpush3.bf16.xpose.msra.mxu0 %v1784_v17 }
 0x21b   : > { %1392 = vmatprep.subr.bf16.mxu0 %v1137_v8 }
 0x222   : > { %1393 = vmatpush3.bf16.xpose.msra.mxu0 %v1780_v14 }
 0x223   : > { %1394 = vmatprep.subr.bf16.mxu0 %v1138_v26 }
 0x22a   : > { %1395 = vmatpush3.bf16.xpose.msra.mxu0 %v1800_v46 }
 0x22b   : > { %1396 = vmatprep.subr.bf16.mxu0 %v1139_v24 }
 0x232   : > { %1397 = vmatpush3.bf16.xpose.msra.mxu0 %v1796_v43 }
 0x239   : > { %1399 = vmatmul.mubr.bf16.vlgmr.msra.gmra.mrb[32].mxu0 %v1710_v47  ;;  %v1541_v47 = vmov 1966171168  }
 0x23a   : > { %v1205_v43 = vunpack.c.l.s4 %v1541_v47 }
 0x23c   : > { %v1206_v36 = vunpack.c.0.s8 %v1205_v43 }
 0x23e   : > { %v1209_v42 = vsub.s32 %v1206_v36, %v1208_v25 }
 0x30c   : > { %v1174_v49 = vpop.f32.mrb[32].mxu0 }
 0x30d   : > { %v1181_v52 = vand.u32 2147483647, %v1174_v49  ;;  %v1176_v55 = vpop.f32.mrb[33].mxu0  ;;  %vm1193_vm3 = vcmp.ge.f32.partialorder %v1174_v49, 0.0 }
 0x30e   : > { %v1182_v27 = vand.u32 2147483647, %v1176_v55  ;;  %v1178_v51 = vpop.f32.mrb[34].mxu0  ;;  %vm1194_vm6 = vcmp.ge.f32.partialorder %v1176_v55, 0.0 }
 0x30f   : > { %v1183_v29 = vsub.f32 0.0, %v1181_v52  ;;  %v1179_v30 = vpop.f32.mrb[35].mxu0 }
 0x310   : > { %v1184_v17 = vsub.f32 0.0, %v1182_v27 }
 0x311   : > { %v1185_v31 = vmul.f32 1.442695, %v1183_v29 }
 0x312   : > { %v1187_v32 = vmul.f32 1.442695, %v1184_v17 }
 0x313   : > { %1525 = vpow2.f32 %v1185_v31 }
 0x314   : > { %1527 = vpow2.f32 %v1187_v32 }
 0x31d   : > { %v1526_v14 = vpop.eup %1525 }
 0x31e   : > { %v1528_v46 = vpop.eup %1527  ;;  %v1189_v33 = vadd.f32 1.0, %v1526_v14 }
 0x31f   : > { %v1190_v34 = vadd.f32 1.0, %v1528_v46 }
 0x320   : > { %1529 = vrcp.f32 %v1189_v33 }
 0x321   : > { %1531 = vrcp.f32 %v1190_v34 }
 0x32a   : > { %v1530_v37 = vpop.eup %1529 }
 0x32b   : > { %v1532_v38 = vpop.eup %1531  ;;  %v1195_v39 = vmul.f32 %v1530_v37, %v1526_v14 }
 0x32c   : > { %v1196_v40 = vmul.f32 %v1532_v38, %v1528_v46 }
 0x32d   : > { %v1197_v41 = vsel %vm1193_vm3, %v1530_v37, %v1195_v39 }
 0x32e   : > { %v1198_v44 = vsel %vm1194_vm6, %v1532_v38, %v1196_v40 }
 0x32f   : > { %v1335_v45 = vpack.c.bf16 %v1198_v44, %v1197_v41 }
 0x331   : > { %v1210_v48 = vrot.slane %v1335_v45, %v1209_v42 }
 0x333   : > { %v1217_v53 = vrot.slane %v1210_v48, %v1209_v42 }
 0x335   : > { %v1227_v54 = vsel %vm1225_vm9, %v1217_v53, %v1226_v50 }
 0x336   : > { %1228 = vst [vmem:[%s305_s30] sm:$0x3] %v1227_v54 }
 0x337 PF: > { %s18_s27 = sadd.s32 1, %s1539_s27  }
 0x338   : > { %p15_p5 = scmp.ge.s32.totalorder %s18_s27, 4  }
 0x33a   :  { %17 = sbr.rel (!%p15_p5) target bundleno = 1 (0x1), region = 82 }

</bundles_post_ra>
